<compile_context>
chip_gen: v6e
topology: v6e:2x2x1
jax: 0.10.0
libtpu: 0.0.40
codegen_flags: <defaults>
</compile_context>

<pallas_src>
import functools
import math

import jax
import jax.numpy as jnp
from jax.experimental import pallas as pl
from jax.experimental.pallas import tpu as pltpu

EPS = 1e-20


# ----------------------------------------------------------------------------
# Kernel
# ----------------------------------------------------------------------------
def _lfq_kernel(
    x_ref, w_in_ref, b_in_ref, w_out_ref, b_out_ref, w_d_ref, b_d_ref, msel_ref,
    out_ref, idx_ref, ent_ref, commit_ref, prob_ref,
    *, num_codebooks, codebook_size, codebook_scale, inv_temperature,
):
    t_step = pl.program_id(1)

    # Zero the per-core accumulator blocks at the start of each core's loop.
    @pl.when(t_step == 0)
    def _():
        ent_ref[...] = jnp.zeros_like(ent_ref)
        commit_ref[...] = jnp.zeros_like(commit_ref)
        prob_ref[...] = jnp.zeros_like(prob_ref)

    x = x_ref[...].astype(jnp.float32)

    # project_in: (tm, dim) @ (dim, nc*cd) + bias
    z = jnp.dot(x, w_in_ref[...], preferred_element_type=jnp.float32) + b_in_ref[...]

    # Binary quantization to +/- codebook_scale.
    x_pos = z > 0.0
    cbv = jnp.full_like(z, codebook_scale)
    quant = jnp.where(x_pos, cbv, -cbv)

    # Lane-dense indices: idx[c, t] = sum_j 2^(cd-1-j) * bit[t, c*cd + j].
    # Computed as a tiny NT matmul so tokens land on the lane axis (unmasked
    # stores) instead of a width-1 masked column store per token block.
    bits_f = x_pos.astype(jnp.float32)
    idx_f = jnp.einsum("ck,tk->ct", msel_ref[...], bits_f,
                       preferred_element_type=jnp.float32)            # (nc, tm)
    idx_ref[...] = idx_f.astype(jnp.int32)

    # Softmax logits.  -dist*invT = invT*(-||z||^2 - ||code||^2 + 2 z.code);
    # the first two terms are per-row / global constants under the softmax, so
    # logits = invT * (x @ w_d + b_d) with w_d = 2*W_in@code^T precomputed.
    logits = (jnp.dot(x, w_d_ref[...], preferred_element_type=jnp.float32)
              + b_d_ref[...])
    if inv_temperature != 1.0:
        logits = logits * inv_temperature

    ent_parts, prob_parts = [], []
    for c in range(num_codebooks):  # static, small
        sl = slice(c * codebook_size, (c + 1) * codebook_size)
        lg = logits[:, sl]
        lg = lg - jnp.max(lg, axis=-1, keepdims=True)
        ex = jnp.exp(lg)
        prob = ex / jnp.sum(ex, axis=-1, keepdims=True)
        ent_parts.append(-prob * jnp.log(jnp.maximum(prob, EPS)))
        prob_parts.append(prob)
    ent_all = ent_parts[0] if num_codebooks == 1 else jnp.concatenate(ent_parts, axis=-1)
    prob_all = prob_parts[0] if num_codebooks == 1 else jnp.concatenate(prob_parts, axis=-1)

    # Per-lane (column) partial sums only; the cross-lane scalar reduction is
    # deferred to the JAX wrapper.  Row 0 of each 8-row accumulator block holds
    # the running partials; rows 1..7 stay zero.
    ent_ref[0:1, :] += jnp.sum(ent_all, axis=0, keepdims=True)
    prob_ref[0:1, :] += jnp.sum(prob_all, axis=0, keepdims=True)
    diff = z - quant
    commit_ref[0:1, :] += jnp.sum(diff * diff, axis=0, keepdims=True)

    # project_out of the (straight-through) quantized values.
    out_ref[...] = (jnp.dot(quant, w_out_ref[...], preferred_element_type=jnp.float32)
                    + b_out_ref[...]).astype(out_ref.dtype)


# ----------------------------------------------------------------------------
# Module-like wrapper
# ----------------------------------------------------------------------------
class LFQPallas:
    def __init__(self, *, dim, codebook_size, entropy_loss_weight=0.1,
                 commitment_loss_weight=1.0, diversity_gamma=2.5,
                 num_codebooks=1, codebook_scale=1.0, key=None):
        assert math.log2(codebook_size).is_integer()
        self.dim = dim
        self.codebook_size = codebook_size
        self.codebook_dim = round(math.log2(codebook_size))
        self.num_codebooks = num_codebooks
        self.codebook_dims = self.codebook_dim * num_codebooks
        self.codebook_scale = codebook_scale
        self.entropy_loss_weight = entropy_loss_weight
        self.commitment_loss_weight = commitment_loss_weight
        self.diversity_gamma = diversity_gamma
        # TODO(synk): nn.Identity() projection path (dim == codebook_dims) not implemented.
        assert dim != self.codebook_dims, "identity projection path not exercised here"

        key = jax.random.PRNGKey(0) if key is None else key
        k1, k2, k3, k4 = jax.random.split(key, 4)
        # torch Linear weights are (out, in); store transposed for the kernel.
        self.w_in_t = (jax.random.normal(k1, (dim, self.codebook_dims), jnp.float32)
                       / math.sqrt(dim))
        self.b_in = 0.01 * jax.random.normal(k2, (1, self.codebook_dims), jnp.float32)
        self.w_out_t = (jax.random.normal(k3, (self.codebook_dims, dim), jnp.float32)
                        / math.sqrt(self.codebook_dims))
        self.b_out = 0.01 * jax.random.normal(k4, (1, dim), jnp.float32)

        # mask = 2^(cd-1) ... 2^0 ; codebook = bits * 2*scale - scale
        nc, cd, cs = num_codebooks, self.codebook_dim, codebook_size
        mask = (2 ** jnp.arange(cd - 1, -1, -1)).astype(jnp.int32)
        self.mask = mask.reshape(1, cd)
        codes = jnp.arange(cs, dtype=jnp.int32)
        bits = ((codes[:, None] & mask) != 0).astype(jnp.float32)
        self.codebook = bits * codebook_scale * 2.0 - codebook_scale      # (cs, cd)

        # Fused logits matmul: softmax(-dist*invT) == softmax(invT*(x@w_d + b_d))
        # because ||z||^2 (per-row) and ||code||^2 (constant) drop under softmax.
        cb_t = self.codebook.T                                            # (cd, cs)
        w_d = jnp.zeros((dim, nc * cs), jnp.float32)
        b_d = jnp.zeros((1, nc * cs), jnp.float32)
        msel = jnp.zeros((nc, nc * cd), jnp.float32)
        for c in range(nc):
            wi = self.w_in_t[:, c * cd:(c + 1) * cd]
            bi = self.b_in[:, c * cd:(c + 1) * cd]
            w_d = w_d.at[:, c * cs:(c + 1) * cs].set(2.0 * (wi @ cb_t))
            b_d = b_d.at[:, c * cs:(c + 1) * cs].set(2.0 * (bi @ cb_t))
            msel = msel.at[c, c * cd:(c + 1) * cd].set(mask.astype(jnp.float32))
        self.w_d, self.b_d, self.msel = w_d, b_d, msel

    def __call__(self, x, inv_temperature=1.0, tm=1024, n_par=2, io_dtype=None):
        B, S, dim = x.shape
        assert dim == self.dim
        M = B * S
        # TODO(synk): pad the token axis instead of requiring a multiple of 128.
        assert M % 128 == 0, "B*S must be a multiple of 128"
        nc, cd, cs = self.num_codebooks, self.codebook_dim, self.codebook_size
        ncd, ncs = nc * cd, nc * cs

        # ---- tiling: large 128-aligned token tiles, optional per-core split ----
        n_par = max(1, int(n_par))
        tm = max(128, min(int(tm), (M // n_par) // 128 * 128))
        while M % tm != 0:
            tm -= 128
        n_tiles = M // tm
        if n_tiles % n_par != 0:
            n_par = 1
        tpc = n_tiles // n_par          # token tiles per (parallel) core

        x_tok = x.reshape(M, dim)
        if io_dtype is not None:        # optional bf16 I/O for bandwidth-bound use
            x_tok = x_tok.astype(io_dtype)
        out_dtype = x_tok.dtype

        kernel = functools.partial(
            _lfq_kernel,
            num_codebooks=nc, codebook_size=cs,
            codebook_scale=self.codebook_scale,
            inv_temperature=float(inv_temperature),
        )

        grid_spec = pltpu.PrefetchScalarGridSpec(
            num_scalar_prefetch=0,
            grid=(n_par, tpc),
            in_specs=[
                pl.BlockSpec((tm, dim), lambda c, t: (c * tpc + t, 0)),   # x tokens
                pl.BlockSpec((dim, ncd), lambda c, t: (0, 0)),            # W_in^T
                pl.BlockSpec((1, ncd), lambda c, t: (0, 0)),              # b_in
                pl.BlockSpec((ncd, dim), lambda c, t: (0, 0)),            # W_out^T
                pl.BlockSpec((1, dim), lambda c, t: (0, 0)),              # b_out
                pl.BlockSpec((dim, ncs), lambda c, t: (0, 0)),            # fused logits W
                pl.BlockSpec((1, ncs), lambda c, t: (0, 0)),              # fused logits b
                pl.BlockSpec((nc, ncd), lambda c, t: (0, 0)),             # index selector
            ],
            out_specs=[
                pl.BlockSpec((tm, dim), lambda c, t: (c * tpc + t, 0)),   # projected out
                pl.BlockSpec((nc, tm), lambda c, t: (0, c * tpc + t)),    # indices (lane-dense)
                pl.BlockSpec((8, ncs), lambda c, t: (c, 0)),              # entropy partials
                pl.BlockSpec((8, ncd), lambda c, t: (c, 0)),              # commitment partials
                pl.BlockSpec((8, ncs), lambda c, t: (c, 0)),              # prob partials
            ],
        )

        out, idx, ent_p, commit_p, prob_p = pl.pallas_call(
            kernel,
            grid_spec=grid_spec,
            out_shape=(
                jax.ShapeDtypeStruct((M, dim), out_dtype),
                jax.ShapeDtypeStruct((nc, M), jnp.int32),
                jax.ShapeDtypeStruct((n_par * 8, ncs), jnp.float32),
                jax.ShapeDtypeStruct((n_par * 8, ncd), jnp.float32),
                jax.ShapeDtypeStruct((n_par * 8, ncs), jnp.float32),
            ),
            compiler_params=pltpu.CompilerParams(
                dimension_semantics=("parallel", "arbitrary")),
        )(x_tok, self.w_in_t, self.b_in, self.w_out_t, self.b_out,
          self.w_d, self.b_d, self.msel)

        # ---- finalize the (scalar-sized) loss reductions in plain JAX ----
        ent_total = jnp.sum(ent_p)
        commit_total = jnp.sum(commit_p)
        avg_prob = jnp.sum(prob_p, axis=0).reshape(nc, cs).sum(axis=0) / (M * nc)

        per_sample_entropy = ent_total / (M * nc * cs)
        codebook_entropy = jnp.mean(-avg_prob * jnp.log(jnp.maximum(avg_prob, EPS)))
        commit_loss = commit_total / (M * nc * cd)

        losses = {
            "per_sample_entropy": per_sample_entropy * self.entropy_loss_weight,
            "batch_entropy": codebook_entropy * self.entropy_loss_weight * -self.diversity_gamma,
            "commitment": commit_loss * self.commitment_loss_weight,
        }
        # TODO(synk): torch promotes indices to int64; int32 is kept here.
        # TODO(synk): forward-only; no custom_vjp for the straight-through-estimator gradient.
        return out.reshape(B, S, dim), idx.T.reshape(B, S, nc), losses


# ----------------------------------------------------------------------------
# Pure-JAX reference (mirrors the PyTorch forward in training mode)
# ----------------------------------------------------------------------------
def _reference(mod: LFQPallas, x, inv_temperature=1.0):
    B, S, dim = x.shape
    z = x @ mod.w_in_t + mod.b_in[0]
    z = z.reshape(B, S, mod.num_codebooks, mod.codebook_dim)
    x_pos = z > 0
    quant = jnp.where(x_pos, mod.codebook_scale, -mod.codebook_scale).astype(jnp.float32)
    idx = jnp.sum(x_pos.astype(jnp.int32) * mod.mask[0], axis=-1)
    x2 = jnp.sum(z ** 2, -1)[..., None]
    y2 = jnp.sum(mod.codebook ** 2, -1)
    xy = jnp.einsum("...id,jd->...ij", z, mod.codebook) * -2.0
    dist = x2 + y2 + xy
    prob = jax.nn.softmax(-dist * inv_temperature, axis=-1)
    ent = lambda p: -p * jnp.log(jnp.maximum(p, EPS))
    per_sample = jnp.mean(ent(prob))
    avg_prob = jnp.mean(prob.reshape(-1, mod.codebook_size), axis=0)
    cb_ent = jnp.mean(ent(avg_prob))
    commit = jnp.mean((z - quant) ** 2)
    out = quant.reshape(B, S, -1) @ mod.w_out_t + mod.b_out[0]
    losses = {
        "per_sample_entropy": per_sample * mod.entropy_loss_weight,
        "batch_entropy": cb_ent * mod.entropy_loss_weight * -mod.diversity_gamma,
        "commitment": commit * mod.commitment_loss_weight,
    }
    return out, idx, losses


if __name__ == "__main__":
    key = jax.random.PRNGKey(0)
    kx, kp = jax.random.split(key)

    B, S, DIM, CODEBOOK_SIZE = 2, 128, 32, 16
    mod = LFQPallas(dim=DIM, codebook_size=CODEBOOK_SIZE, key=kp)

    x = jax.random.normal(kx, (B, S, DIM), jnp.float32)

    out, idx, losses = mod(x)
    jax.block_until_ready((out, idx, losses))

    ref_out, ref_idx, ref_losses = _reference(mod, x)

    assert out.shape == (B, S, DIM) and idx.shape == (B, S, 1)
    assert jnp.allclose(out, ref_out, atol=1e-3, rtol=1e-3)
    assert jnp.all(idx[..., 0] == ref_idx[..., 0])
    for k in losses:
        assert jnp.allclose(losses[k], ref_losses[k], atol=1e-3, rtol=1e-3), k

    print("KERNEL_OK")
</pallas_src>

<mosaic_0001>
module attributes {stable_mosaic.version = 11 : i64} {
  func.func @_lfq_kernel(%arg0: i32, %arg1: i32, %arg2: memref<128x32xf32, #tpu.memory_space<vmem>>, %arg3: memref<32x4xf32, #tpu.memory_space<vmem>>, %arg4: memref<1x4xf32, #tpu.memory_space<vmem>>, %arg5: memref<4x32xf32, #tpu.memory_space<vmem>>, %arg6: memref<1x32xf32, #tpu.memory_space<vmem>>, %arg7: memref<32x16xf32, #tpu.memory_space<vmem>>, %arg8: memref<1x16xf32, #tpu.memory_space<vmem>>, %arg9: memref<1x4xf32, #tpu.memory_space<vmem>>, %arg10: memref<128x32xf32, #tpu.memory_space<vmem>>, %arg11: memref<1x128xi32, #tpu.memory_space<vmem>>, %arg12: memref<8x16xf32, #tpu.memory_space<vmem>>, %arg13: memref<8x4xf32, #tpu.memory_space<vmem>>, %arg14: memref<8x16xf32, #tpu.memory_space<vmem>>) attributes {dimension_semantics = [#tpu.dimension_semantics<parallel>, #tpu.dimension_semantics<arbitrary>], iteration_bounds = array<i64: 2, 1>, scalar_prefetch = 0 : i64, scratch_operands = 0 : i64, tpu.core_type = #tpu.core_type<tc>, window_params = [{transform_indices = @transform_0, window_bounds = array<i64: 128, 32>}, {pipeline_mode = #tpu.pipeline_mode<synchronous>, transform_indices = @transform_1, window_bounds = array<i64: 32, 4>}, {pipeline_mode = #tpu.pipeline_mode<synchronous>, transform_indices = @transform_2, window_bounds = array<i64: 1, 4>}, {pipeline_mode = #tpu.pipeline_mode<synchronous>, transform_indices = @transform_3, window_bounds = array<i64: 4, 32>}, {pipeline_mode = #tpu.pipeline_mode<synchronous>, transform_indices = @transform_4, window_bounds = array<i64: 1, 32>}, {pipeline_mode = #tpu.pipeline_mode<synchronous>, transform_indices = @transform_5, window_bounds = array<i64: 32, 16>}, {pipeline_mode = #tpu.pipeline_mode<synchronous>, transform_indices = @transform_6, window_bounds = array<i64: 1, 16>}, {pipeline_mode = #tpu.pipeline_mode<synchronous>, transform_indices = @transform_7, window_bounds = array<i64: 1, 4>}, {transform_indices = @transform_8, window_bounds = array<i64: 128, 32>}, {transform_indices = @transform_9, window_bounds = array<i64: 1, 128>}, {transform_indices = @transform_10, window_bounds = array<i64: 8, 16>}, {transform_indices = @transform_11, window_bounds = array<i64: 8, 4>}, {transform_indices = @transform_12, window_bounds = array<i64: 8, 16>}]} {
    %c0_i32 = arith.constant 0 : i32
    %0 = arith.cmpi eq, %arg1, %c0_i32 : i32
    %1 = arith.extui %0 : i1 to i32
    %c0_i32_0 = arith.constant 0 : i32
    %2 = arith.cmpi ne, %1, %c0_i32_0 : i32
    scf.if %2 {
      %cst_45 = arith.constant 0.000000e+00 : f32
      %64 = vector.broadcast %cst_45 : f32 to vector<8x16xf32>
      %c0_46 = arith.constant 0 : index
      %c0_47 = arith.constant 0 : index
      %65 = vector.load %arg12[%c0_46, %c0_47] : memref<8x16xf32, #tpu.memory_space<vmem>>, vector<8x16xf32>
      tpu.vector_store %arg12[%c0_46, %c0_47], %64 {strides = array<i32>} : memref<8x16xf32, #tpu.memory_space<vmem>>, vector<8x16xf32>,
      %cst_48 = arith.constant 0.000000e+00 : f32
      %66 = vector.broadcast %cst_48 : f32 to vector<8x4xf32>
      %c0_49 = arith.constant 0 : index
      %c0_50 = arith.constant 0 : index
      %67 = vector.load %arg13[%c0_49, %c0_50] : memref<8x4xf32, #tpu.memory_space<vmem>>, vector<8x4xf32>
      tpu.vector_store %arg13[%c0_49, %c0_50], %66 {strides = array<i32>} : memref<8x4xf32, #tpu.memory_space<vmem>>, vector<8x4xf32>,
      %cst_51 = arith.constant 0.000000e+00 : f32
      %68 = vector.broadcast %cst_51 : f32 to vector<8x16xf32>
      %c0_52 = arith.constant 0 : index
      %c0_53 = arith.constant 0 : index
      %69 = vector.load %arg14[%c0_52, %c0_53] : memref<8x16xf32, #tpu.memory_space<vmem>>, vector<8x16xf32>
      tpu.vector_store %arg14[%c0_52, %c0_53], %68 {strides = array<i32>} : memref<8x16xf32, #tpu.memory_space<vmem>>, vector<8x16xf32>,
    } else {
    }
    %c0 = arith.constant 0 : index
    %c0_1 = arith.constant 0 : index
    %3 = vector.load %arg2[%c0, %c0_1] : memref<128x32xf32, #tpu.memory_space<vmem>>, vector<128x32xf32>
    %c0_2 = arith.constant 0 : index
    %c0_3 = arith.constant 0 : index
    %4 = vector.load %arg3[%c0_2, %c0_3] : memref<32x4xf32, #tpu.memory_space<vmem>>, vector<32x4xf32>
    %cst = arith.constant dense<0.000000e+00> : vector<128x4xf32>
    %5 = tpu.matmul %3, %4, %cst {dimension_numbers = #tpu.dot_dimension_numbers<[1], [0], [0], [1], [0, 0, 1, 1], [], []>} : vector<128x32xf32>, vector<32x4xf32>, vector<128x4xf32> -> vector<128x4xf32>
    %c0_4 = arith.constant 0 : index
    %c0_5 = arith.constant 0 : index
    %6 = vector.load %arg4[%c0_4, %c0_5] : memref<1x4xf32, #tpu.memory_space<vmem>>, vector<1x4xf32>
    %7 = vector.broadcast %6 : vector<1x4xf32> to vector<128x4xf32>
    %8 = arith.addf %5, %7 : vector<128x4xf32>
    %cst_6 = arith.constant 0.000000e+00 : f32
    %9 = vector.broadcast %cst_6 : f32 to vector<128x4xf32>
    %10 = arith.cmpf ogt, %8, %9 : vector<128x4xf32>
    %cst_7 = arith.constant 1.000000e+00 : f32
    %11 = vector.broadcast %cst_7 : f32 to vector<128x4xf32>
    %cst_8 = arith.constant 0.000000e+00 : f32
    %12 = vector.broadcast %cst_8 : f32 to vector<128x4xf32>
    %13 = arith.subf %12, %11 : vector<128x4xf32>
    %14 = arith.select %10, %11, %13 : vector<128x4xi1>, vector<128x4xf32>
    %15 = arith.extui %10 : vector<128x4xi1> to vector<128x4xi32>
    %16 = arith.sitofp %15 : vector<128x4xi32> to vector<128x4xf32>
    %c0_9 = arith.constant 0 : index
    %c0_10 = arith.constant 0 : index
    %17 = vector.load %arg9[%c0_9, %c0_10] : memref<1x4xf32, #tpu.memory_space<vmem>>, vector<1x4xf32>
    "tpu.trace_start"() <{level = 10 : i32, message = "ck,tk->ct"}> : () -> ()
    %cst_11 = arith.constant dense<0.000000e+00> : vector<1x128xf32>
    %18 = tpu.matmul %17, %16, %cst_11 {dimension_numbers = #tpu.dot_dimension_numbers<[1], [1], [0], [0], [0, 0, 1, 0], [], []>} : vector<1x4xf32>, vector<128x4xf32>, vector<1x128xf32> -> vector<1x128xf32>
    "tpu.trace_stop"() : () -> ()
    %19 = arith.fptosi %18 : vector<1x128xf32> to vector<1x128xi32>
    %c0_12 = arith.constant 0 : index
    %c0_13 = arith.constant 0 : index
    %20 = vector.load %arg11[%c0_12, %c0_13] : memref<1x128xi32, #tpu.memory_space<vmem>>, vector<1x128xi32>
    tpu.vector_store %arg11[%c0_12, %c0_13], %19 {strides = array<i32>} : memref<1x128xi32, #tpu.memory_space<vmem>>, vector<1x128xi32>,
    %c0_14 = arith.constant 0 : index
    %c0_15 = arith.constant 0 : index
    %21 = vector.load %arg7[%c0_14, %c0_15] : memref<32x16xf32, #tpu.memory_space<vmem>>, vector<32x16xf32>
    %cst_16 = arith.constant dense<0.000000e+00> : vector<128x16xf32>
    %22 = tpu.matmul %3, %21, %cst_16 {dimension_numbers = #tpu.dot_dimension_numbers<[1], [0], [0], [1], [0, 0, 1, 1], [], []>} : vector<128x32xf32>, vector<32x16xf32>, vector<128x16xf32> -> vector<128x16xf32>
    %c0_17 = arith.constant 0 : index
    %c0_18 = arith.constant 0 : index
    %23 = vector.load %arg8[%c0_17, %c0_18] : memref<1x16xf32, #tpu.memory_space<vmem>>, vector<1x16xf32>
    %24 = vector.broadcast %23 : vector<1x16xf32> to vector<128x16xf32>
    %25 = arith.addf %22, %24 : vector<128x16xf32>
    %cst_19 = arith.constant dense<0xFF800000> : vector<128xf32>
    %26 = vector.multi_reduction <maximumf>, %25, %cst_19 [1] : vector<128x16xf32> to vector<128xf32>
    %27 = vector.shape_cast %26 : vector<128xf32> to vector<128x1xf32>
    %28 = vector.broadcast %27 : vector<128x1xf32> to vector<128x16xf32>
    %29 = arith.subf %25, %28 : vector<128x16xf32>
    %30 = math.exp %29 : vector<128x16xf32>
    %cst_20 = arith.constant dense<0.000000e+00> : vector<128xf32>
    %31 = vector.multi_reduction <add>, %30, %cst_20 [1] : vector<128x16xf32> to vector<128xf32>
    %32 = vector.shape_cast %31 : vector<128xf32> to vector<128x1xf32>
    %33 = vector.broadcast %32 : vector<128x1xf32> to vector<128x16xf32>
    %34 = arith.divf %30, %33 : vector<128x16xf32>
    %cst_21 = arith.constant 0.000000e+00 : f32
    %35 = vector.broadcast %cst_21 : f32 to vector<128x16xf32>
    %36 = arith.subf %35, %34 : vector<128x16xf32>
    %cst_22 = arith.constant 9.99999968E-21 : f32
    %37 = vector.broadcast %cst_22 : f32 to vector<128x16xf32>
    %38 = arith.maximumf %34, %37 : vector<128x16xf32>
    %39 = math.log %38 : vector<128x16xf32>
    %40 = arith.mulf %36, %39 : vector<128x16xf32>
    %c0_23 = arith.constant 0 : index
    %c0_24 = arith.constant 0 : index
    %41 = vector.load %arg12[%c0_23, %c0_24] : memref<8x16xf32, #tpu.memory_space<vmem>>, vector<1x16xf32>
    %cst_25 = arith.constant dense<0.000000e+00> : vector<16xf32>
    %42 = vector.multi_reduction <add>, %40, %cst_25 [0] : vector<128x16xf32> to vector<16xf32>
    %43 = vector.shape_cast %42 : vector<16xf32> to vector<1x16xf32>
    %44 = arith.addf %41, %43 : vector<1x16xf32>
    %c0_26 = arith.constant 0 : index
    %c0_27 = arith.constant 0 : index
    %45 = vector.load %arg12[%c0_26, %c0_27] : memref<8x16xf32, #tpu.memory_space<vmem>>, vector<1x16xf32>
    tpu.vector_store %arg12[%c0_26, %c0_27], %44 {strides = array<i32>} : memref<8x16xf32, #tpu.memory_space<vmem>>, vector<1x16xf32>,
    %c0_28 = arith.constant 0 : index
    %c0_29 = arith.constant 0 : index
    %46 = vector.load %arg14[%c0_28, %c0_29] : memref<8x16xf32, #tpu.memory_space<vmem>>, vector<1x16xf32>
    %cst_30 = arith.constant dense<0.000000e+00> : vector<16xf32>
    %47 = vector.multi_reduction <add>, %34, %cst_30 [0] : vector<128x16xf32> to vector<16xf32>
    %48 = vector.shape_cast %47 : vector<16xf32> to vector<1x16xf32>
    %49 = arith.addf %46, %48 : vector<1x16xf32>
    %c0_31 = arith.constant 0 : index
    %c0_32 = arith.constant 0 : index
    %50 = vector.load %arg14[%c0_31, %c0_32] : memref<8x16xf32, #tpu.memory_space<vmem>>, vector<1x16xf32>
    tpu.vector_store %arg14[%c0_31, %c0_32], %49 {strides = array<i32>} : memref<8x16xf32, #tpu.memory_space<vmem>>, vector<1x16xf32>,
    %51 = arith.subf %8, %14 : vector<128x4xf32>
    %c0_33 = arith.constant 0 : index
    %c0_34 = arith.constant 0 : index
    %52 = vector.load %arg13[%c0_33, %c0_34] : memref<8x4xf32, #tpu.memory_space<vmem>>, vector<1x4xf32>
    %53 = arith.mulf %51, %51 : vector<128x4xf32>
    %cst_35 = arith.constant dense<0.000000e+00> : vector<4xf32>
    %54 = vector.multi_reduction <add>, %53, %cst_35 [0] : vector<128x4xf32> to vector<4xf32>
    %55 = vector.shape_cast %54 : vector<4xf32> to vector<1x4xf32>
    %56 = arith.addf %52, %55 : vector<1x4xf32>
    %c0_36 = arith.constant 0 : index
    %c0_37 = arith.constant 0 : index
    %57 = vector.load %arg13[%c0_36, %c0_37] : memref<8x4xf32, #tpu.memory_space<vmem>>, vector<1x4xf32>
    tpu.vector_store %arg13[%c0_36, %c0_37], %56 {strides = array<i32>} : memref<8x4xf32, #tpu.memory_space<vmem>>, vector<1x4xf32>,
    %c0_38 = arith.constant 0 : index
    %c0_39 = arith.constant 0 : index
    %58 = vector.load %arg5[%c0_38, %c0_39] : memref<4x32xf32, #tpu.memory_space<vmem>>, vector<4x32xf32>
    %cst_40 = arith.constant dense<0.000000e+00> : vector<128x32xf32>
    %59 = tpu.matmul %14, %58, %cst_40 {dimension_numbers = #tpu.dot_dimension_numbers<[1], [0], [0], [1], [0, 0, 1, 1], [], []>} : vector<128x4xf32>, vector<4x32xf32>, vector<128x32xf32> -> vector<128x32xf32>
    %c0_41 = arith.constant 0 : index
    %c0_42 = arith.constant 0 : index
    %60 = vector.load %arg6[%c0_41, %c0_42] : memref<1x32xf32, #tpu.memory_space<vmem>>, vector<1x32xf32>
    %61 = vector.broadcast %60 : vector<1x32xf32> to vector<128x32xf32>
    %62 = arith.addf %59, %61 : vector<128x32xf32>
    %c0_43 = arith.constant 0 : index
    %c0_44 = arith.constant 0 : index
    %63 = vector.load %arg10[%c0_43, %c0_44] : memref<128x32xf32, #tpu.memory_space<vmem>>, vector<128x32xf32>
    tpu.vector_store %arg10[%c0_43, %c0_44], %62 {strides = array<i32>} : memref<128x32xf32, #tpu.memory_space<vmem>>, vector<128x32xf32>,
    return
  }
  func.func @transform_0(%arg0: i32, %arg1: i32) -> (i32, i32) {
    %c1_i32 = arith.constant 1 : i32
    %0 = arith.muli %arg0, %c1_i32 : i32
    %1 = arith.addi %0, %arg1 : i32
    %c0_i32 = arith.constant 0 : i32
    %c0_i32_0 = arith.constant 0 : i32
    return %1, %c0_i32 : i32, i32
  }
  func.func @transform_1(%arg0: i32, %arg1: i32) -> (i32, i32) {
    %c0_i32 = arith.constant 0 : i32
    %c0_i32_0 = arith.constant 0 : i32
    %c0_i32_1 = arith.constant 0 : i32
    return %c0_i32, %c0_i32_0 : i32, i32
  }
  func.func @transform_2(%arg0: i32, %arg1: i32) -> (i32, i32) {
    %c0_i32 = arith.constant 0 : i32
    %c0_i32_0 = arith.constant 0 : i32
    %c0_i32_1 = arith.constant 0 : i32
    return %c0_i32, %c0_i32_0 : i32, i32
  }
  func.func @transform_3(%arg0: i32, %arg1: i32) -> (i32, i32) {
    %c0_i32 = arith.constant 0 : i32
    %c0_i32_0 = arith.constant 0 : i32
    %c0_i32_1 = arith.constant 0 : i32
    return %c0_i32, %c0_i32_0 : i32, i32
  }
  func.func @transform_4(%arg0: i32, %arg1: i32) -> (i32, i32) {
    %c0_i32 = arith.constant 0 : i32
    %c0_i32_0 = arith.constant 0 : i32
    %c0_i32_1 = arith.constant 0 : i32
    return %c0_i32, %c0_i32_0 : i32, i32
  }
  func.func @transform_5(%arg0: i32, %arg1: i32) -> (i32, i32) {
    %c0_i32 = arith.constant 0 : i32
    %c0_i32_0 = arith.constant 0 : i32
    %c0_i32_1 = arith.constant 0 : i32
    return %c0_i32, %c0_i32_0 : i32, i32
  }
  func.func @transform_6(%arg0: i32, %arg1: i32) -> (i32, i32) {
    %c0_i32 = arith.constant 0 : i32
    %c0_i32_0 = arith.constant 0 : i32
    %c0_i32_1 = arith.constant 0 : i32
    return %c0_i32, %c0_i32_0 : i32, i32
  }
  func.func @transform_7(%arg0: i32, %arg1: i32) -> (i32, i32) {
    %c0_i32 = arith.constant 0 : i32
    %c0_i32_0 = arith.constant 0 : i32
    %c0_i32_1 = arith.constant 0 : i32
    return %c0_i32, %c0_i32_0 : i32, i32
  }
  func.func @transform_8(%arg0: i32, %arg1: i32) -> (i32, i32) {
    %c1_i32 = arith.constant 1 : i32
    %0 = arith.muli %arg0, %c1_i32 : i32
    %1 = arith.addi %0, %arg1 : i32
    %c0_i32 = arith.constant 0 : i32
    %c0_i32_0 = arith.constant 0 : i32
    return %1, %c0_i32 : i32, i32
  }
  func.func @transform_9(%arg0: i32, %arg1: i32) -> (i32, i32) {
    %c1_i32 = arith.constant 1 : i32
    %0 = arith.muli %arg0, %c1_i32 : i32
    %1 = arith.addi %0, %arg1 : i32
    %c0_i32 = arith.constant 0 : i32
    %c0_i32_0 = arith.constant 0 : i32
    return %c0_i32, %1 : i32, i32
  }
  func.func @transform_10(%arg0: i32, %arg1: i32) -> (i32, i32) {
    %c0_i32 = arith.constant 0 : i32
    %c0_i32_0 = arith.constant 0 : i32
    return %arg0, %c0_i32 : i32, i32
  }
  func.func @transform_11(%arg0: i32, %arg1: i32) -> (i32, i32) {
    %c0_i32 = arith.constant 0 : i32
    %c0_i32_0 = arith.constant 0 : i32
    return %arg0, %c0_i32 : i32, i32
  }
  func.func @transform_12(%arg0: i32, %arg1: i32) -> (i32, i32) {
    %c0_i32 = arith.constant 0 : i32
    %c0_i32_0 = arith.constant 0 : i32
    return %arg0, %c0_i32 : i32, i32
  }
}

</mosaic_0001>

<bundles_post_ra>
// kernel: tpu_custom_call.1
= control target key start
LH: loop header
LB: loop body
LE: loop exit
PB: predicated region body
PF: predicated region fallthrough
CT: control target
= control target key end

     0   :  { %s3513_s0 = inlined_call_operand.vmem [shape: f32[256,32], index: 0, kind: input, shape index: {}]   ;;  %s3514_s1 = inlined_call_operand.vmem [shape: f32[32,4], index: 1, kind: input, shape index: {}]   ;;  %s3515_s2 = inlined_call_operand.vmem [shape: f32[1,4], index: 2, kind: input, shape index: {}]   ;;  %s3516_s3 = inlined_call_operand.vmem [shape: f32[4,32], index: 3, kind: input, shape index: {}]   ;;  %s3517_s4 = inlined_call_operand.vmem [shape: f32[1,32], index: 4, kind: input, shape index: {}]   ;;  %s3518_s5 = inlined_call_operand.vmem [shape: f32[32,16], index: 5, kind: input, shape index: {}]   ;;  %s3519_s6 = inlined_call_operand.vmem [shape: f32[1,16], index: 6, kind: input, shape index: {}]   ;;  %s3520_s7 = inlined_call_operand.vmem [shape: f32[1,4], index: 7, kind: input, shape index: {}]   ;;  %s3521_s8 = inlined_call_operand.vmem [shape: f32[256,32], index: 8, kind: output, shape index: {0}]   ;;  %s3522_s9 = inlined_call_operand.hbm [shape: s32[1,256], index: 9, kind: output, shape index: {1}]   ;;  %s3523_s10 = inlined_call_operand.hbm [shape: f32[16,16], index: 10, kind: output, shape index: {2}]   ;;  %s3524_s11 = inlined_call_operand.vmem [shape: f32[16,4], index: 11, kind: output, shape index: {3}]   ;;  %s3525_s12 = inlined_call_operand.hbm [shape: f32[16,16], index: 12, kind: output, shape index: {4}]  }
   0x1   :  { %3533 = sst [smem:[#allocation11_spill]] %s3513_s0 }
   0x2   :  { %3534 = sst [smem:[#allocation12_spill]] %s3514_s1 }
   0x3   :  { %3535 = sst [smem:[#allocation13_spill]] %s3515_s2 }
   0x4   :  { %3536 = sst [smem:[#allocation14_spill]] %s3516_s3 }
   0x5   :  { %3537 = sst [smem:[#allocation15_spill]] %s3517_s4 }
   0x6   :  { %18 = vsyncpa [#allocation3], 0 }
   0x7   :  { %20 = vsyncpa [#allocation3 + $0x1], 0 }
   0x8   :  { %21 = vsyncpa [#allocation5], 0 }
   0x9   :  { %23 = vsyncpa [#allocation5 + $0x1], 0  ;;  %s2607_s21 = smov 0   ;;  %s2609_s22 = smov 0  }
   0xa   :  { %s2611_s23 = smov 0   ;;  %s2613_s24 = smov 0  }
   0xb   :  { %s2615_s25 = smov 0   ;;  %s2617_s26 = smov 0  }
   0xc LB: > { %3538 = sst [smem:[#allocation9_spill]] %s2530_s25  ;;  %s3527_s27 = sadd.s32 4294967295, %s2534_s26   ;;  %s2534_s26 = sphi %s2617_s26, %s29_s26   ;;  %s2530_s25 = sphi %s2615_s25, %s3569_s25   ;;  %s2526_s24 = sphi %s2613_s24, %s3568_s24   ;;  %s2522_s23 = sphi %s2611_s23, %s3572_s23   ;;  %s2518_s22 = sphi %s2609_s22, %s3571_s22   ;;  %s2514_s21 = sphi %s2607_s21, %s3570_s21  }
   0xd   : > { %s3526_s28 = sadd.s32 4294967294, %s2534_s26   ;;  %s41_s29 = sadd.s32 1, %s2530_s25 }
   0xe   : > { %s253_s30 = sadd.s32 1, %s2522_s23  ;;  %p43_p0 = scmp.ge.s32.totalorder %s41_s29, 2 }
   0xf   : > { %p263_p1 = scmp.ne.s32.totalorder %s2522_s23, %s2518_s22  ;;  %p264_p2 = scmp.eq.s32.totalorder %s3527_s27, 1 }
  0x10   : > { %p269_p3 = scmp.ne.s32.totalorder %s2518_s22, %s2514_s21  ;;  %s3574_s29 = smov (%p43_p0, %s41_s29), 0 }
  0x11   : > { %3539 = sst [smem:[#allocation10_spill]] %s3574_s29  ;;  %p2649_p4 = por %p264_p2, %p263_p1 }
  0x12   : > { %p270_p5 = scmp.eq.s32.totalorder %s3526_s28, 1  ;;  %s250_s14 = ssub.s32 %s2530_s25, %s3574_s29 }
  0x13   : > { %p1935_p6 = scmp.ge.s32.totalorder %s2534_s26, 1  ;;  %p251_p7 = scmp.eq.s32.totalorder %s250_s14, 0 }
  0x14   : > { %p2658_p8 = por %p270_p5, %p269_p3  ;;  %p398_p9 = scmp.lt.s32.totalorder %s2534_s26, 3 }
  0x15   : > { %s2664_s16 = scalar_select %p251_p7, %s2522_s23, %s253_s30  }
  0x16   : > { %p399_p10 = pnand %p1935_p6, %p398_p9 }
  0x17   : > { %s3542_s1 = sld [smem:[#allocation12_spill]] (!%p399_p10)  ;;  %s2673_s28 = sshll.u32 (!%p399_p10), %s2526_s24, 4 }
  0x18   : > { %402 = sbr.rel (%p399_p10) target bundleno = 698 (0x2ba), region = 52  ;;  %p462_p11 = scmp.lt.s32.totalorder (!%p399_p10), %s2673_s28, 31 }
  0x19   : > { %s3543_s0 = sld [smem:[#allocation11_spill]] (!%p399_p10)  ;;  %p477_p12 = scmp.lt.s32.totalorder (!%p399_p10), %s2526_s24, 1 }
  0x1a   : > { %s3544_s3 = sld [smem:[#allocation14_spill]] (!%p399_p10)  ;;  %s3285_s18 = scalar_lea.hbm (!%p399_p10), %s3522_s9, %s2673_s28 }
  0x1b   : > { %s3545_s2 = sld [smem:[#allocation13_spill]] (!%p399_p10) }
  0x1c   : > { %s3549_s4 = sld [smem:[#allocation15_spill]] (!%p399_p10) }
  0x1d   : > { %v509_v0 = vld [vmem:[%s3542_s1 + $0x18] sm:$0xff]  ;;  %v508_v1 = vld [vmem:[%s3542_s1 + $0x10] sm:$0xff]  ;;  %v507_v2 = vld [vmem:[%s3542_s1 + $0x8] sm:$0xff]  ;;  %s2680_s27 = scalar_select %p462_p11, %s2673_s28, 31  ;;  %vm3530_vm0 = vcmask 261120   ;;  %vm3531_vm1 = vcmask 1043456  }
  0x1e   : > { %2109 = vmatprep.subr.mxu0 %v509_v0  ;;  %v506_v3 = vld [vmem:[%s3542_s1] sm:$0xff]  ;;  %v903_v4 = vld [vmem:[%s3518_s5 + $0x18] sm:$0xff]  ;;  %v902_v8 = vld [vmem:[%s3518_s5 + $0x10] sm:$0xff]  ;;  %v2536_v25 = vmov 0.0   ;;  %s478_s17 = scalar_select %p477_p12, %s2526_s24, 1  ;;  %vm487_vm2 = vcmask 31744  }
  0x1f   : > { %2110 = vmatpush3.msra.mxu0 %v509_v0  ;;  %s1939_s19 = sshll.u32 %s2680_s27, 3  ;;  %v901_v10 = vld [vmem:[%s3518_s5 + $0x8] sm:$0xff]  ;;  %v900_v12 = vld [vmem:[%s3518_s5] sm:$0xff]  ;;  %2141 = vmatprep.subr.mxu1 %v2536_v25  ;;  %vm2537_vm3 = vmmov 0   ;;  %v2538_v31 = vmov -1.0  }
  0x20   : > { %2111 = vmatprep.subr.mxu0 %v508_v1  ;;  %s2691_s30 = scalar_lea.vmem %s3543_s0, %s1939_s19  ;;  %v2756_v24 = vld [vmem:[%s3544_s3] sm:$0xf]  ;;  %s1942_s25 = sshll.u32 %s478_s17, 3  ;;  %2173 = vmatprep.mubr.msk.f32.mxu1 %vm2537_vm3, %v2536_v25 }
  0x21   : > { %2112 = vmatpush3.msra.mxu0 %v508_v1  ;;  %v490_v5 = vld [vmem:[%s2691_s30] sm:$0xff]  ;;  %v491_v6 = vld [vmem:[%s2691_s30 + $0x8] sm:$0xff]  ;;  %v492_v7 = vld [vmem:[%s2691_s30 + $0x10] sm:$0xff]  ;;  %s2768_s14 = scalar_lea.vmem %s3524_s11, %s1942_s25  ;;  %s3178_s0 = scalar_lea.vmem %s3521_s8, %s1939_s19 }
  0x22   : > { %2113 = vmatprep.subr.mxu0 %v507_v2  ;;  %2117 = vmatprep.mubr.msk.f32.mxu0 %vm3530_vm0, %v490_v5  ;;  %v493_v9 = vld [vmem:[%s2691_s30 + $0x18] sm:$0xff]  ;;  %v494_v11 = vld [vmem:[%s2691_s30 + $0x20] sm:$0xff]  ;;  %v495_v13 = vld [vmem:[%s2691_s30 + $0x28] sm:$0xff]  ;;  %488 = vst.msk [vmem:[%s2768_s14] sm:$0xff] %vm487_vm2, %v2536_v25 }
  0x23   : > { %2114 = vmatpush3.msra.mxu0 %v507_v2  ;;  %v496_v14 = vld [vmem:[%s2691_s30 + $0x30] sm:$0xff]  ;;  %v497_v15 = vld [vmem:[%s2691_s30 + $0x38] sm:$0xff]  ;;  %v498_v16 = vld [vmem:[%s2691_s30 + $0x40] sm:$0xff] }
  0x24   : > { %2115 = vmatprep.subr.mxu0 %v506_v3  ;;  %v499_v17 = vld [vmem:[%s2691_s30 + $0x48] sm:$0xff]  ;;  %v500_v18 = vld [vmem:[%s2691_s30 + $0x50] sm:$0xff]  ;;  %v501_v19 = vld [vmem:[%s2691_s30 + $0x58] sm:$0xff] }
  0x25   : > { %2116 = vmatpush3.msra.mxu0 %v506_v3  ;;  %v502_v20 = vld [vmem:[%s2691_s30 + $0x60] sm:$0xff]  ;;  %v503_v21 = vld [vmem:[%s2691_s30 + $0x68] sm:$0xff]  ;;  %v504_v22 = vld [vmem:[%s2691_s30 + $0x70] sm:$0xff] }
  0x26   : > { %2118 = vmatmul.mubr.msk.f32.vlgmr.msra.gmra.mxu0 %vm3530_vm0, %v491_v6  ;;  %2176 = vmatprep.subr.mxu0 %v903_v4  ;;  %v505_v23 = vld [vmem:[%s2691_s30 + $0x78] sm:$0xff]  ;;  %v2777_v26 = vld [vmem:[%s3545_s2] ss:$0 sm:$0xff]  ;;  %s2539_s2 = smov [#allocation2]  }
  0x27   : > { %2177 = vmatpush3.msra.mxu0 %v903_v4  ;;  %2120 = vmatprep.mubr.msk.f32.mxu0 %vm3530_vm0, %v492_v7  ;;  %s2406_s3 = sshll.u32 %s2539_s2, 4  ;;  %s2407_s3 = int_to_ptr.vmem [resolvable:$false] %s2406_s3 }
  0x28   : > { %2178 = vmatprep.subr.mxu0 %v902_v8 }
  0x29   : > { %2179 = vmatpush3.msra.mxu0 %v902_v8 }
  0x2a   : > { %2121 = vmatmul.mubr.msk.f32.gmra.mxu0 %vm3530_vm0, %v493_v9  ;;  %2180 = vmatprep.subr.mxu0 %v901_v10 }
  0x2b   : > { %2123 = vmatprep.mubr.msk.f32.mxu0 %vm3530_vm0, %v494_v11  ;;  %2181 = vmatpush3.msra.mxu0 %v901_v10 }
  0x2c   : > { %2182 = vmatprep.subr.mxu0 %v900_v12 }
  0x2d   : > { %2183 = vmatpush3.msra.mxu0 %v900_v12 }
  0x2e   : > { %2124 = vmatmul.mubr.msk.f32.gmra.mxu0 %vm3530_vm0, %v495_v13  ;;  %2208 = vmatprep.subr.msk.mxu0 %vm3531_vm1, %v2756_v24 }
  0x2f   : > { %2126 = vmatprep.mubr.msk.f32.mxu0 %vm3530_vm0, %v496_v14 }
  0x32   : > { %2127 = vmatmul.mubr.msk.f32.gmra.mxu0 %vm3530_vm0, %v497_v15 }
  0x33   : > { %2129 = vmatprep.mubr.msk.f32.mxu0 %vm3530_vm0, %v498_v16 }
  0x36   : > { %2130 = vmatmul.mubr.msk.f32.gmra.mxu0 %vm3530_vm0, %v499_v17 }
  0x37   : > { %2132 = vmatprep.mubr.msk.f32.mxu0 %vm3530_vm0, %v500_v18 }
  0x3a   : > { %2133 = vmatmul.mubr.msk.f32.gmra.mxu0 %vm3530_vm0, %v501_v19 }
  0x3b   : > { %2135 = vmatprep.mubr.msk.f32.mxu0 %vm3530_vm0, %v502_v20 }
  0x3e   : > { %2136 = vmatmul.mubr.msk.f32.gmra.mxu0 %vm3530_vm0, %v503_v21 }
  0x3f   : > { %2138 = vmatprep.mubr.msk.f32.mxu0 %vm3530_vm0, %v504_v22 }
  0x42   : > { %2139 = vmatmul.mubr.msk.f32.gmra.mxu0 %vm3530_vm0, %v505_v23 }
  0x43   : > { %2184 = vmatprep.mubr.msk.f32.mxu0 %vm3530_vm0, %v490_v5 }
  0x46   : > { %2185 = vmatmul.mubr.msk.f32.vlgmr.msra.gmra.mxu0 %vm3530_vm0, %v491_v6 }
  0x47   : > { %2187 = vmatprep.mubr.msk.f32.mxu0 %vm3530_vm0, %v492_v7  ;;  %2209 = vmatpush3.msk.msra.mxu0 %vm3531_vm1, %v2756_v24 }
  0x4a   : > { %2188 = vmatmul.mubr.msk.f32.gmra.mxu0 %vm3530_vm0, %v493_v9 }
  0x4b   : > { %2190 = vmatprep.mubr.msk.f32.mxu0 %vm3530_vm0, %v494_v11 }
  0x4e   : > { %2191 = vmatmul.mubr.msk.f32.gmra.mxu0 %vm3530_vm0, %v495_v13 }
  0x4f   : > { %2193 = vmatprep.mubr.msk.f32.mxu0 %vm3530_vm0, %v496_v14 }
  0x52   : > { %2194 = vmatmul.mubr.msk.f32.gmra.mxu0 %vm3530_vm0, %v497_v15 }
  0x53   : > { %2196 = vmatprep.mubr.msk.f32.mxu0 %vm3530_vm0, %v498_v16 }
  0x56   : > { %2197 = vmatmul.mubr.msk.f32.gmra.mxu0 %vm3530_vm0, %v499_v17 }
  0x57   : > { %2199 = vmatprep.mubr.msk.f32.mxu0 %vm3530_vm0, %v500_v18 }
  0x5a   : > { %2200 = vmatmul.mubr.msk.f32.gmra.mxu0 %vm3530_vm0, %v501_v19 }
  0x5b   : > { %2202 = vmatprep.mubr.msk.f32.mxu0 %vm3530_vm0, %v502_v20 }
  0x5e   : > { %2203 = vmatmul.mubr.msk.f32.gmra.mxu0 %vm3530_vm0, %v503_v21 }
  0x5f   : > { %2205 = vmatprep.mubr.msk.f32.mxu0 %vm3530_vm0, %v504_v22 }
  0x62   : > { %2206 = vmatmul.mubr.msk.f32.gmra.mxu0 %vm3530_vm0, %v505_v23 }
  0xe6   : > { %v2119_v27 = vpop.f32.mrf.mxu0 }
  0xe7   : > { %v2780_v28 = vadd.f32 %v2119_v27, %v2777_v26 }
  0xe8   : > { %v632_v29 = vpop.f32.mrf.mxu0 }
  0xe9   : > { %vm712_vm4 = vcmp.gt.f32.partialorder %v2780_v28, 0.0  ;;  %v2784_v30 = vadd.f32 %v2777_v26, %v632_v29 }
  0xea   : > { %v728_v32 = vsel %vm712_vm4, 1.0, %v2538_v31  ;;  %v2122_v33 = vpop.f32.mrf.mxu0 }
  0xeb   : > { %v1395_v34 = vsub.f32 %v2780_v28, %v728_v32  ;;  %vm3532_vm5 = vcmp.gt.f32.partialorder %v2784_v30, 0.0  ;;  %v2792_v35 = vadd.f32 %v2122_v33, %v2777_v26 }
  0xec   : > { %v727_v36 = vsel %vm3532_vm5, 1.0, %v2538_v31  ;;  %v642_v37 = vpop.f32.mrf.mxu0 }
  0xed   : > { %v1394_v38 = vsub.f32 %v2784_v30, %v727_v36  ;;  %vm714_vm6 = vcmp.gt.f32.partialorder %v2792_v35, 0.0  ;;  %v2800_v39 = vadd.f32 %v2777_v26, %v642_v37  ;;  %2210 = vmatprep.mubr.msk.f32.mxu0 %vm487_vm2, %v727_v36  ;;  %v1412_v42 = vmul.f32 %v1395_v34, %v1395_v34 }
  0xee   : > { %v730_v40 = vsel %vm714_vm6, 1.0, %v2538_v31  ;;  %v2125_v41 = vpop.f32.mrf.mxu0  ;;  %2211 = vmatmul.mubr.msk.f32.vlgmr.msra.gmra.mxu0 %vm487_vm2, %v728_v32 }
  0xef   : > { %v1411_v43 = vmul.f32 %v1394_v38, %v1394_v38  ;;  %v1397_v44 = vsub.f32 %v2792_v35, %v730_v40  ;;  %vm713_vm7 = vcmp.gt.f32.partialorder %v2800_v39, 0.0  ;;  %v2813_v46 = vadd.f32 %v2125_v41, %v2777_v26 }
  0xf0   : > { %v729_v45 = vsel %vm713_vm7, 1.0, %v2538_v31  ;;  %v652_v47 = vpop.f32.mrf.mxu0  ;;  %v1428_v53 = vsel %vm487_vm2, %v1412_v42, 0.0 }
  0xf1   : > { %v1427_v48 = vsel %vm487_vm2, %v1411_v43, 0.0  ;;  %v1396_v49 = vsub.f32 %v2800_v39, %v729_v45  ;;  %v2818_v50 = vadd.f32 %v2777_v26, %v652_v47  ;;  %2213 = vmatprep.mubr.msk.f32.mxu0 %vm487_vm2, %v729_v45  ;;  %v1414_v51 = vmul.f32 %v1397_v44, %v1397_v44  ;;  %v775_v39 = vld [vmem:[%s3520_s7] sm:$0x1] }
  0xf2   : > { %vm716_vm8 = vcmp.gt.f32.partialorder %v2813_v46, 0.0  ;;  %v2128_v52 = vpop.f32.mrf.mxu0  ;;  %2214 = vmatmul.mubr.msk.f32.gmra.mxu0 %vm487_vm2, %v730_v40  ;;  %v1429_v56 = vadd.f32 %v1428_v53, %v1427_v48 }
  0xf3   : > { %v1413_v54 = vmul.f32 %v1396_v49, %v1396_v49  ;;  %v732_v55 = vsel %vm716_vm8, 1.0, %v2538_v31  ;;  %vm715_vm9 = vcmp.gt.f32.partialorder %v2818_v50, 0.0  ;;  %v2833_v59 = vadd.f32 %v2128_v52, %v2777_v26 }
  0xf4   : > { %v1399_v57 = vsub.f32 %v2813_v46, %v732_v55  ;;  %v731_v58 = vsel %vm715_vm9, 1.0, %v2538_v31  ;;  %v662_v60 = vpop.f32.mrf.mxu0  ;;  %v1432_v0 = vsel %vm487_vm2, %v1414_v51, 0.0  ;;  %v1962_v46 = vsel %vm713_vm7, 1.0, %v2536_v25 }
  0xf5   : > { %v1430_v61 = vsel %vm487_vm2, %v1413_v54, 0.0  ;;  %v1398_v62 = vsub.f32 %v2818_v50, %v731_v58  ;;  %v2838_v63 = vadd.f32 %v2777_v26, %v662_v60  ;;  %2216 = vmatprep.mubr.msk.f32.mxu0 %vm487_vm2, %v731_v58  ;;  %vm718_vm10 = vcmp.gt.f32.partialorder %v2833_v59, 0.0 }
  0xf6   : > { %v1431_v1 = vadd.f32 %v1430_v61, %v1429_v56  ;;  %v1416_v2 = vmul.f32 %v1399_v57, %v1399_v57  ;;  %v2131_v3 = vpop.f32.mrf.mxu0  ;;  %2217 = vmatmul.mubr.msk.f32.gmra.mxu0 %vm487_vm2, %v732_v55  ;;  %v2847_v5 = vsel %vm718_vm10, 1.0, %v2538_v31  ;;  %v1961_v50 = vsel %vm712_vm4, 1.0, %v2536_v25 }
  0xf7   : > { %v1415_v4 = vmul.f32 %v1398_v62, %v1398_v62  ;;  %vm717_vm11 = vcmp.gt.f32.partialorder %v2838_v63, 0.0  ;;  %v2851_v6 = vadd.f32 %v2131_v3, %v2777_v26  ;;  %v1401_v8 = vsub.f32 %v2833_v59, %v2847_v5 }
  0xf8   : > { %v1433_v7 = vadd.f32 %v1432_v0, %v1431_v1  ;;  %v2858_v9 = vsel %vm717_vm11, 1.0, %v2538_v31  ;;  %v672_v10 = vpop.f32.mrf.mxu0  ;;  %v1436_v14 = vsel %vm487_vm2, %v1416_v2, 0.0  ;;  %v1966_v59 = vsel %vm717_vm11, 1.0, %v2536_v25 }
  0xf9   : > { %v1434_v11 = vsel %vm487_vm2, %v1415_v4, 0.0  ;;  %v1400_v12 = vsub.f32 %v2838_v63, %v2858_v9  ;;  %vm720_vm12 = vcmp.gt.f32.partialorder %v2851_v6, 0.0  ;;  %v2865_v13 = vadd.f32 %v2777_v26, %v672_v10 }
  0xfa   : > { %v1435_v15 = vadd.f32 %v1434_v11, %v1433_v7  ;;  %v1418_v16 = vmul.f32 %v1401_v8, %v1401_v8  ;;  %v2871_v17 = vsel %vm720_vm12, 1.0, %v2538_v31  ;;  %v2134_v18 = vpop.f32.mrf.mxu0  ;;  %v1964_v63 = vsel %vm715_vm9, 1.0, %v2536_v25 }
  0xfb   : > { %v1417_v19 = vmul.f32 %v1400_v12, %v1400_v12  ;;  %v1403_v20 = vsub.f32 %v2851_v6, %v2871_v17  ;;  %vm719_vm13 = vcmp.gt.f32.partialorder %v2865_v13, 0.0  ;;  %v2877_v21 = vadd.f32 %v2134_v18, %v2777_v26 }
  0xfc   : > { %v1437_v22 = vadd.f32 %v1436_v14, %v1435_v15  ;;  %v2882_v23 = vsel %vm719_vm13, 1.0, %v2538_v31  ;;  %v682_v27 = vpop.f32.mrf.mxu0  ;;  %v1440_v33 = vsel %vm487_vm2, %v1418_v16, 0.0  ;;  %v2942_v16 = vld [vmem:[%s3519_s6] ss:$0 sm:$0xff] }
  0xfd   : > { %v1438_v29 = vsel %vm487_vm2, %v1417_v19, 0.0  ;;  %v1402_v32 = vsub.f32 %v2865_v13, %v2882_v23  ;;  %vm722_vm14 = vcmp.gt.f32.partialorder %v2877_v21, 0.0  ;;  %v2895_v37 = vadd.f32 %v2777_v26, %v682_v27 }
  0xfe   : > { %v1439_v34 = vadd.f32 %v1438_v29, %v1437_v22  ;;  %v2892_v36 = vsel %vm722_vm14, 1.0, %v2538_v31  ;;  %v2137_v38 = vpop.f32.mrf.mxu0  ;;  %v1420_v40 = vmul.f32 %v1403_v20, %v1403_v20  ;;  %v1967_v13 = vsel %vm718_vm10, 1.0, %v2536_v25 }
  0xff   : > { %v1419_v41 = vmul.f32 %v1402_v32, %v1402_v32  ;;  %v1405_v42 = vsub.f32 %v2877_v21, %v2892_v36  ;;  %v698_v43 = vadd.f32 %v2137_v38, %v2777_v26  ;;  %vm721_vm15 = vcmp.gt.f32.partialorder %v2895_v37, 0.0 }
 0x100   : > { %v1441_v44 = vadd.f32 %v1440_v33, %v1439_v34  ;;  %v692_v45 = vpop.f32.mrf.mxu0  ;;  %v2905_v48 = vsel %vm721_vm15, 1.0, %v2538_v31  ;;  %v1444_v55 = vsel %vm487_vm2, %v1420_v40, 0.0 }
 0x101   : > { %v1442_v47 = vsel %vm487_vm2, %v1419_v41, 0.0  ;;  %vm724_vm3 = vcmp.gt.f32.partialorder %v698_v43, 0.0  ;;  %v1404_v51 = vsub.f32 %v2895_v37, %v2905_v48  ;;  %v2914_v53 = vadd.f32 %v2777_v26, %v692_v45 }
 0x102   : > { %v1443_v49 = vadd.f32 %v1442_v47, %v1441_v44  ;;  %v2911_v52 = vsel %vm724_vm3, 1.0, %v2538_v31  ;;  %v2140_v54 = vpop.f32.mrf.mxu0  ;;  %v1422_v56 = vmul.f32 %v1405_v42, %v1405_v42 }
 0x103   : > { %v708_v57 = vadd.f32 %v2140_v54, %v2777_v26  ;;  %v1421_v58 = vmul.f32 %v1404_v51, %v1404_v51  ;;  %v1407_v61 = vsub.f32 %v698_v43, %v2911_v52  ;;  %vm723_vm0 = vcmp.gt.f32.partialorder %v2914_v53, 0.0 }
 0x104   : > { %v1445_v60 = vadd.f32 %v1444_v55, %v1443_v49  ;;  %v702_v62 = vpop.f32.mrf.mxu0  ;;  %v2923_v0 = vsel %vm723_vm0, 1.0, %v2538_v31  ;;  %v1448_v10 = vsel %vm487_vm2, %v1422_v56, 0.0  ;;  %v1973_v51 = vsel %vm724_vm3, 1.0, %v2536_v25 }
 0x105   : > { %vm726_vm1 = vcmp.gt.f32.partialorder %v708_v57, 0.0  ;;  %v703_v1 = vadd.f32 %v2777_v26, %v702_v62  ;;  %v1446_v2 = vsel %vm487_vm2, %v1421_v58, 0.0  ;;  %v1406_v3 = vsub.f32 %v2914_v53, %v2923_v0 }
 0x106   : > { %v2930_v4 = vsel %vm726_vm1, 1.0, %v2538_v31  ;;  %v2186_v7 = vpop.f32.mrf.mxu0  ;;  %v1975_v8 = vsel %vm726_vm1, 1.0, %v2536_v25  ;;  %v1447_v11 = vadd.f32 %v1446_v2, %v1445_v60  ;;  %v1424_v12 = vmul.f32 %v1407_v61, %v1407_v61 }
 0x107   : > { %vm725_vm5 = vcmp.gt.f32.partialorder %v703_v1, 0.0  ;;  %2142 = vmatpush3.xpose.msk.msra.mxu1 %vm487_vm2, %v1975_v8  ;;  %v1423_v14 = vmul.f32 %v1406_v3, %v1406_v3  ;;  %v1409_v26 = vsub.f32 %v708_v57, %v2930_v4  ;;  %vm485_vm1 = vcmask 130048  }
 0x108   : > { %v2937_v15 = vsel %vm725_vm5, 1.0, %v2538_v31  ;;  %v977_v18 = vpop.f32.mrf.mxu0  ;;  %2143 = vmatprep.subr.mxu1 %v2536_v25  ;;  %v1449_v19 = vadd.f32 %v1448_v10, %v1447_v11  ;;  %v1974_v31 = vsel %vm725_vm5, 1.0, %v2536_v25  ;;  %v1452_v34 = vsel %vm487_vm2, %v1424_v12, 0.0 }
 0x109   : > { %v1408_v20 = vsub.f32 %v703_v1, %v2937_v15  ;;  %v2947_v22 = vadd.f32 %v2942_v16, %v977_v18  ;;  %v1450_v27 = vsel %vm487_vm2, %v1423_v14, 0.0  ;;  %v1426_v38 = vmul.f32 %v1409_v26, %v1409_v26 }
 0x10a   : > { %v2189_v29 = vpop.f32.mrf.mxu0  ;;  %v1451_v32 = vadd.f32 %v1450_v27, %v1449_v19  ;;  %v2954_v40 = vadd.f32 %v2186_v7, %v2942_v16  ;;  %v1972_v1 = vsel %vm723_vm0, 1.0, %v2536_v25  ;;  %v1971_v14 = vsel %vm722_vm14, 1.0, %v2536_v25 }
 0x10b   : > { %v1425_v33 = vmul.f32 %v1408_v20, %v1408_v20  ;;  %2144 = vmatpush3.xpose.msk.msra.mxu1 %vm487_vm2, %v1974_v31  ;;  %v1057_v42 = vsel %vm485_vm1, %v2947_v22, -inf  ;;  %v2966_v55 = vadd.f32 %v2189_v29, %v2942_v16  ;;  %v1456_v57 = vsel %vm487_vm2, %v1426_v38, 0.0 }
 0x10c   : > { %v987_v41 = vpop.f32.mrf.mxu0  ;;  %2145 = vmatprep.subr.mxu1 %v2536_v25  ;;  %v1453_v44 = vadd.f32 %v1452_v34, %v1451_v32  ;;  %1058 = vmax.xlane.f32.xlu0 %v1057_v42  ;;  %v1060_v60 = vsel %vm485_vm1, %v2954_v40, -inf  ;;  %v1970_v32 = vsel %vm721_vm15, 1.0, %v2536_v25  ;;  %v1410_v42 = vld [vmem:[%s2768_s14] sm:$0x1]  ;;  %vm1465_vm0 = vcmask 24576  }
 0x10d   : > { %v1454_v45 = vsel %vm487_vm2, %v1425_v33, 0.0  ;;  %v2961_v47 = vadd.f32 %v2942_v16, %v987_v41  ;;  %v1066_v7 = vsel %vm485_vm1, %v2966_v55, -inf  ;;  %vm3546_vm5 = vcmp.gt.f32.partialorder %v2784_v30, 0.0 }
 0x10e   : > { %v2192_v49 = vpop.f32.mrf.mxu0  ;;  %v1455_v54 = vadd.f32 %v1454_v45, %v1453_v44  ;;  %v1960_v35 = vsel %vm3546_vm5, 1.0, %v2536_v25 }
 0x10f   : > { %2146 = vmatpush3.xpose.msk.msra.mxu1 %vm487_vm2, %v1973_v51  ;;  %v1063_v56 = vsel %vm485_vm1, %v2961_v47, -inf  ;;  %v2982_v3 = vadd.f32 %v2192_v49, %v2942_v16  ;;  %v1969_v51 = vsel %vm720_vm12, 1.0, %v2536_v25 }
 0x110   : > { %v997_v58 = vpop.f32.mrf.mxu0  ;;  %1064 = vmax.xlane.f32.xlu1 %v1063_v56  ;;  %2147 = vmatprep.subr.mxu1 %v2536_v25  ;;  %v1457_v43 = vadd.f32 %v1456_v57, %v1455_v54 }
 0x111   : > { %v2976_v61 = vadd.f32 %v2942_v16, %v997_v58  ;;  %1061 = vmax.xlane.f32.xlu0 %v1060_v60  ;;  %v1072_v19 = vsel %vm485_vm1, %v2982_v3, -inf }
 0x112   : > { %v2195_v62 = vpop.f32.mrf.mxu0  ;;  %v1458_v2 = vrot.slane %v1457_v43, 4 }
 0x113   : > { %2148 = vmatpush3.xpose.msk.msra.mxu1 %vm487_vm2, %v1972_v1  ;;  %v1069_v8 = vsel %vm485_vm1, %v2976_v61, -inf  ;;  %v2997_v18 = vadd.f32 %v2195_v62, %v2942_v16  ;;  %v1968_v62 = vsel %vm719_vm13, 1.0, %v2536_v25 }
 0x114   : > { %v1007_v10 = vpop.f32.mrf.mxu0  ;;  %1067 = vmax.xlane.f32.xlu1 %v1066_v7  ;;  %2149 = vmatprep.subr.mxu1 %v2536_v25  ;;  %v1459_v11 = vadd.f32 %v1458_v2, %v1457_v43 }
 0x115   : > { %v2991_v53 = vadd.f32 %v2942_v16, %v1007_v10  ;;  %1070 = vmax.xlane.f32.xlu0 %v1069_v8  ;;  %v1078_v38 = vsel %vm485_vm1, %v2997_v18, -inf }
 0x116   : > { %v2198_v12 = vpop.f32.mrf.mxu0  ;;  %v1460_v26 = vrot.slane %v1459_v11, 2 }
 0x117   : > { %2150 = vmatpush3.xpose.msk.msra.mxu1 %vm487_vm2, %v1971_v14  ;;  %v1075_v20 = vsel %vm485_vm1, %v2991_v53, -inf  ;;  %v3012_v34 = vadd.f32 %v2198_v12, %v2942_v16 }
 0x118   : > { %v1017_v27 = vpop.f32.mrf.mxu0  ;;  %1073 = vmax.xlane.f32.xlu1 %v1072_v19  ;;  %2151 = vmatprep.subr.mxu1 %v2536_v25  ;;  %v1461_v29 = vadd.f32 %v1460_v26, %v1459_v11  ;;  %v1965_v26 = vsel %vm716_vm8, 1.0, %v2536_v25  ;;  %v1963_v19 = vsel %vm714_vm6, 1.0, %v2536_v25  ;;  %vm3547_vm6 = vcmask 1043456  }
 0x119   : > { %v3006_v21 = vadd.f32 %v2942_v16, %v1017_v27  ;;  %1076 = vmax.xlane.f32.xlu0 %v1075_v20  ;;  %v1084_v57 = vsel %vm485_vm1, %v3012_v34, -inf  ;;  %vm3548_vm4 = vmmov %vm3547_vm6 }
 0x11a   : > { %v2201_v31 = vpop.f32.mrf.mxu0  ;;  %v1462_v33 = vrot.slane %v1461_v29, 1 }
 0x11b   : > { %2152 = vmatpush3.xpose.msk.msra.mxu1 %vm487_vm2, %v1970_v32  ;;  %v1081_v41 = vsel %vm485_vm1, %v3006_v21, -inf  ;;  %v3028_v56 = vadd.f32 %v2201_v31, %v2942_v16 }
 0x11c   : > { %v1027_v44 = vpop.f32.mrf.mxu0  ;;  %1079 = vmax.xlane.f32.xlu1 %v1078_v38  ;;  %2153 = vmatprep.subr.mxu1 %v2536_v25  ;;  %v1463_v37 = vadd.f32 %v1462_v33, %v1461_v29 }
 0x11d   : > { %v3022_v45 = vadd.f32 %v2942_v16, %v1027_v44  ;;  %1082 = vmax.xlane.f32.xlu0 %v1081_v41  ;;  %v1090_v2 = vsel %vm485_vm1, %v3028_v56, -inf }
 0x11e   : > { %v2204_v49 = vpop.f32.mrf.mxu0  ;;  %v1464_v54 = vadd.f32 %v1463_v37, %v1410_v42 }
 0x11f   : > { %2154 = vmatpush3.xpose.msk.msra.mxu1 %vm487_vm2, %v1969_v51  ;;  %v1087_v58 = vsel %vm485_vm1, %v3022_v45, -inf  ;;  %v3044_v1 = vadd.f32 %v2204_v49, %v2942_v16 }
 0x120   : > { %v1037_v60 = vpop.f32.mrf.mxu0  ;;  %1085 = vmax.xlane.f32.xlu1 %v1084_v57  ;;  %2155 = vmatprep.subr.mxu1 %v2536_v25  ;;  %1466 = vst.msk [vmem:[%s2768_s14] sm:$0x1] %vm1465_vm0, %v1464_v54  ;;  %s3116_s14 = sand.u32 1, %s2518_s22   ;;  %v3169_v57 = vld [vmem:[%s3549_s4] ss:$0 sm:$0xff]  ;;  %s2408_s4 = scalar_lea.vmem %s2407_s3, 32 }
 0x121   : > { %v3038_v6 = vadd.f32 %v2942_v16, %v1037_v60  ;;  %1088 = vmax.xlane.f32.xlu0 %v1087_v58  ;;  %v1096_v12 = vsel %vm485_vm1, %v3044_v1, -inf  ;;  %s1936_s30 = sshll.u32 %s3116_s14, 3  ;;  %s439_s27 = scalar_lea.vmem [#allocation2], %s3116_s14 }
 0x122   : > { %v2207_v43 = vpop.f32.mrf.mxu0  ;;  %s3121_s29 = scalar_lea.vmem [#allocation4], %s1936_s30  ;;  %s3126_s17 = scalar_lea.vmem [#allocation6], %s1936_s30 }
 0x123   : > { %2156 = vmatpush3.xpose.msk.msra.mxu1 %vm487_vm2, %v1968_v62  ;;  %v1093_v7 = vsel %vm485_vm1, %v3038_v6, -inf  ;;  %v3059_v11 = vadd.f32 %v2207_v43, %v2942_v16  ;;  %486 = vst.msk [vmem:[%s3121_s29] sm:$0xff] %vm485_vm1, %v2536_v25  ;;  %489 = vst.msk [vmem:[%s3126_s17] sm:$0xff] %vm485_vm1, %v2536_v25  ;;  %s1727_s20 = sshll.u32 %s439_s27, 4  ;;  %s1695_s30 = scalar_lea.sflag [#allocation3], %s3116_s14  ;;  %s1728_s20 = int_to_ptr.vmem [resolvable:$true] %s1727_s20 }
 0x124   : > { %v1047_v8 = vpop.f32.mrf.mxu0  ;;  %1091 = vmax.xlane.f32.xlu1 %v1090_v2  ;;  %2157 = vmatprep.subr.mxu1 %v2536_v25  ;;  %s2402_s1 = scalar_lea.vmem %s1728_s20, 16  ;;  %p2409_p2 = scmp.lt.s32.totalorder %s1728_s20, %s2407_s3 }
 0x125   : > { %v3053_v10 = vadd.f32 %v2942_v16, %v1047_v8  ;;  %1094 = vmax.xlane.f32.xlu0 %v1093_v7  ;;  %v1102_v16 = vsel %vm485_vm1, %v3059_v11, -inf  ;;  %p2403_p13 = scmp.ne.s32.totalorder %s1728_s20, %s2402_s1  ;;  %p2410_p3 = scmp.lt.s32.totalorder %s2408_s4, %s2402_s1 }
 0x127   : > { %2158 = vmatpush3.xpose.msk.msra.mxu1 %vm487_vm2, %v1967_v13  ;;  %v1099_v14 = vsel %vm485_vm1, %v3053_v10, -inf  ;;  %p2404_p0 = pnand %p2403_p13, %p2649_p4  ;;  %p2411_p5 = por %p2410_p3, %p2409_p2 }
 0x128   : > { %1097 = vmax.xlane.f32.xlu1 %v1096_v12  ;;  %2159 = vmatprep.subr.mxu1 %v2536_v25 }
 0x129   : > { %1100 = vmax.xlane.f32.xlu0 %v1099_v14  ;;  %p2405_p1 = pneg %p2404_p0 }
 0x12b   : > { %2160 = vmatpush3.xpose.msk.msra.mxu1 %vm487_vm2, %v1966_v59  ;;  %p2412_p6 = pnand %p2411_p5, %p2405_p1 }
 0x12c   : > { %1103 = vmax.xlane.f32.xlu1 %v1102_v16  ;;  %2161 = vmatprep.subr.mxu1 %v2536_v25 }
 0x12f   : > { %2162 = vmatpush3.xpose.msk.msra.mxu1 %vm487_vm2, %v1965_v26 }
 0x130   : > { %2163 = vmatprep.subr.mxu1 %v2536_v25 }
 0x133   : > { %2164 = vmatpush3.xpose.msk.msra.mxu1 %vm487_vm2, %v1964_v63 }
 0x134   : > { %2165 = vmatprep.subr.mxu1 %v2536_v25 }
 0x137   : > { %2166 = vmatpush3.xpose.msk.msra.mxu1 %vm487_vm2, %v1963_v19 }
 0x138   : > { %2167 = vmatprep.subr.mxu1 %v2536_v25 }
 0x13b   : > { %2168 = vmatpush3.xpose.msk.msra.mxu1 %vm487_vm2, %v1962_v46 }
 0x13c   : > { %2169 = vmatprep.subr.mxu1 %v2536_v25 }
 0x13f   : > { %2170 = vmatpush3.xpose.msk.msra.mxu1 %vm487_vm2, %v1961_v50 }
 0x140   : > { %2171 = vmatprep.subr.mxu1 %v2536_v25 }
 0x143   : > { %2172 = vmatpush3.xpose.msk.msra.mxu1 %vm487_vm2, %v1960_v35 }
 0x144   : > { %2234 = vmatprep.subr.msk.mxu1 %vm3547_vm6, %v2756_v24 }
 0x146   : > { %2174 = vmatmul.mubr.msk.f32.vlgmr.msra.gmra.mxu1 %vm487_vm2, %v775_v39 }
 0x147   : > { %2219 = vmatprep.mubr.msk.f32.mxu1 %vm487_vm2, %v2858_v9  ;;  %2235 = vmatpush3.msk.msra.mxu1 %vm3548_vm4, %v2756_v24 }
 0x14a   : > { %2220 = vmatmul.mubr.msk.f32.vlgmr.msra.gmra.mxu1 %vm487_vm2, %v2847_v5 }
 0x14b   : > { %2222 = vmatprep.mubr.msk.f32.mxu1 %vm487_vm2, %v2882_v23 }
 0x14e   : > { %2223 = vmatmul.mubr.msk.f32.gmra.mxu1 %vm487_vm2, %v2871_v17 }
 0x14f   : > { %2225 = vmatprep.mubr.msk.f32.mxu1 %vm487_vm2, %v2905_v48 }
 0x152   : > { %2226 = vmatmul.mubr.msk.f32.gmra.mxu1 %vm487_vm2, %v2892_v36 }
 0x153   : > { %2228 = vmatprep.mubr.msk.f32.mxu1 %vm487_vm2, %v2923_v0 }
 0x156   : > { %2229 = vmatmul.mubr.msk.f32.gmra.mxu1 %vm487_vm2, %v2911_v52 }
 0x157   : > { %2231 = vmatprep.mubr.msk.f32.mxu1 %vm487_vm2, %v2937_v15 }
 0x15a   : > { %2232 = vmatmul.mubr.msk.f32.gmra.mxu1 %vm487_vm2, %v2930_v4  ;;  %vm3550_vm2 = vcmask 261120  }
 0x15b   : > { %vm3551_vm7 = vmmov %vm3550_vm2 }
 0x15c   : > { %vm3552_vm8 = vmmov %vm3550_vm2 }
 0x15d   : > { %vm3553_vm9 = vmmov %vm3550_vm2 }
 0x15e   : > { %vm3554_vm10 = vmmov %vm3550_vm2 }
 0x15f   : > { %vm3555_vm11 = vmmov %vm3550_vm2 }
 0x160   : > { %vm3556_vm12 = vmmov %vm3550_vm2 }
 0x161   : > { %vm3557_vm13 = vmmov %vm3550_vm2 }
 0x162   : > { %vm3558_vm14 = vmmov %vm3550_vm2 }
 0x163   : > { %vm3559_vm15 = vmmov %vm3550_vm2 }
 0x164   : > { %vm3560_vm3 = vmmov %vm3550_vm2 }
 0x165   : > { %vm3561_vm0 = vmmov %vm3550_vm2 }
 0x166   : > { %vm3562_vm5 = vmmov %vm3561_vm0 }
 0x167   : > { %vm3563_vm6 = vmmov %vm3561_vm0 }
 0x168   : > { %vm3564_vm4 = vmmov %vm3561_vm0 }
 0x195   : > { %v1059_v24 = vpop.xlane.xlu0 %1058 }
 0x196   : > { %v1105_v25 = vsub.f32 %v2947_v22, %v1059_v24 }
 0x198   : > { %v1121_v28 = vmul.f32 1.442695, %v1105_v25 }
 0x199   : > { %v1065_v30 = vpop.xlane.xlu1 %1064 }
 0x19a   : > { %v1107_v5 = vsub.f32 %v2961_v47, %v1065_v30  ;;  %v1062_v9 = vpop.xlane.xlu0 %1061  ;;  %2306 = vpow2.f32 %v1121_v28 }
 0x19b   : > { %v1106_v17 = vsub.f32 %v2954_v40, %v1062_v9 }
 0x19c   : > { %v1125_v23 = vmul.f32 1.442695, %v1107_v5 }
 0x19d   : > { %v1123_v36 = vmul.f32 1.442695, %v1106_v17  ;;  %v1068_v48 = vpop.xlane.xlu1 %1067 }
 0x19e   : > { %2308 = vpow2.f32 %v1125_v23  ;;  %v1108_v52 = vsub.f32 %v2966_v55, %v1068_v48  ;;  %v1071_v0 = vpop.xlane.xlu0 %1070 }
 0x19f   : > { %2310 = vpow2.f32 %v1123_v36  ;;  %v1109_v4 = vsub.f32 %v2976_v61, %v1071_v0 }
 0x1a0   : > { %v1127_v15 = vmul.f32 1.442695, %v1108_v52 }
 0x1a1   : > { %v1129_v22 = vmul.f32 1.442695, %v1109_v4  ;;  %v1074_v20 = vpop.xlane.xlu1 %1073 }
 0x1a2   : > { %2312 = vpow2.f32 %v1127_v15  ;;  %v1110_v47 = vsub.f32 %v2982_v3, %v1074_v20  ;;  %v1077_v27 = vpop.xlane.xlu0 %1076 }
 0x1a3   : > { %2314 = vpow2.f32 %v1129_v22  ;;  %v1111_v40 = vsub.f32 %v2991_v53, %v1077_v27 }
 0x1a4   : > { %v1131_v29 = vmul.f32 1.442695, %v1110_v47 }
 0x1a5   : > { %v1133_v31 = vmul.f32 1.442695, %v1111_v40  ;;  %v1080_v32 = vpop.xlane.xlu1 %1079 }
 0x1a6   : > { %2316 = vpow2.f32 %v1131_v29  ;;  %v1112_v55 = vsub.f32 %v2997_v18, %v1080_v32  ;;  %v1083_v33 = vpop.xlane.xlu0 %1082 }
 0x1a7   : > { %2318 = vpow2.f32 %v1133_v31  ;;  %v1113_v61 = vsub.f32 %v3006_v21, %v1083_v33  ;;  %v3154_v38 = vpop.eup %2306 }
 0x1a8   : > { %v1135_v41 = vmul.f32 1.442695, %v1112_v55  ;;  %v1153_v3 = vsel %vm485_vm1, %v3154_v38, 0.0 }
 0x1a9   : > { %v1137_v42 = vmul.f32 1.442695, %v1113_v61  ;;  %v1086_v44 = vpop.xlane.xlu1 %1085  ;;  %1154 = vadd.xlane.f32.xlu0 %v1153_v3 }
 0x1aa   : > { %2320 = vpow2.f32 %v1135_v41  ;;  %v1114_v53 = vsub.f32 %v3012_v34, %v1086_v44  ;;  %v1089_v37 = vpop.xlane.xlu0 %1088 }
 0x1ab   : > { %v3159_v49 = vpop.eup %2308  ;;  %2322 = vpow2.f32 %v1137_v42  ;;  %v1115_v18 = vsub.f32 %v3022_v45, %v1089_v37 }
 0x1ac   : > { %v3162_v21 = vpop.eup %2310  ;;  %v1139_v51 = vmul.f32 1.442695, %v1114_v53  ;;  %v1159_v54 = vsel %vm485_vm1, %v3159_v49, 0.0 }
 0x1ad   : > { %v1141_v58 = vmul.f32 1.442695, %v1115_v18  ;;  %v1092_v34 = vpop.xlane.xlu1 %1091  ;;  %v1156_v60 = vsel %vm485_vm1, %v3162_v21, 0.0  ;;  %1160 = vadd.xlane.f32.xlu0 %v1159_v54 }
 0x1ae   : > { %2324 = vpow2.f32 %v1139_v51  ;;  %v1116_v45 = vsub.f32 %v3028_v56, %v1092_v34  ;;  %1157 = vadd.xlane.f32.xlu1 %v1156_v60  ;;  %v1095_v43 = vpop.xlane.xlu0 %1094  ;;  %v2212_v62 = vpop.f32.mrf.mxu0 }
 0x1af   : > { %v3181_v2 = vpop.eup %2312  ;;  %2326 = vpow2.f32 %v1141_v58  ;;  %v1117_v7 = vsub.f32 %v3038_v6, %v1095_v43  ;;  %v1599_v8 = vadd.f32 %v2212_v62, %v3169_v57 }
 0x1b0   : > { %v3185_v13 = vpop.eup %2314  ;;  %v1143_v12 = vmul.f32 1.442695, %v1116_v45  ;;  %v1593_v14 = vpop.f32.mrf.mxu0  ;;  %v1162_v59 = vsel %vm485_vm1, %v3181_v2, 0.0 }
 0x1b1   : > { %v1145_v56 = vmul.f32 1.442695, %v1117_v7  ;;  %1673 = vst.msk [vmem:[%s3178_s0 + $0x8] sm:$0xff] %vm3550_vm2, %v1599_v8  ;;  %v1594_v16 = vadd.f32 %v3169_v57, %v1593_v14  ;;  %v1098_v26 = vpop.xlane.xlu1 %1097  ;;  %v1165_v63 = vsel %vm485_vm1, %v3185_v13, 0.0 }
 0x1b2   : > { %2328 = vpow2.f32 %v1143_v12  ;;  %v1118_v6 = vsub.f32 %v3044_v1, %v1098_v26  ;;  %1163 = vadd.xlane.f32.xlu1 %v1162_v59  ;;  %1166 = vadd.xlane.f32.xlu0 %v1165_v63  ;;  %v1101_v19 = vpop.xlane.xlu0 %1100  ;;  %v2215_v46 = vpop.f32.mrf.mxu0 }
 0x1b3   : > { %v3195_v50 = vpop.eup %2316  ;;  %2330 = vpow2.f32 %v1145_v56  ;;  %1672 = vst.msk [vmem:[%s3178_s0] sm:$0xff] %vm3551_vm7, %v1594_v16  ;;  %v1119_v35 = vsub.f32 %v3053_v10, %v1101_v19  ;;  %v1609_v39 = vadd.f32 %v2215_v46, %v3169_v57 }
 0x1b4   : > { %v3201_v24 = vpop.eup %2318  ;;  %v1147_v25 = vmul.f32 1.442695, %v1118_v6  ;;  %v1603_v28 = vpop.f32.mrf.mxu0  ;;  %v1168_v1 = vsel %vm485_vm1, %v3195_v50, 0.0 }
 0x1b5   : > { %v1149_v30 = vmul.f32 1.442695, %v1119_v35  ;;  %1675 = vst.msk [vmem:[%s3178_s0 + $0x18] sm:$0xff] %vm3552_vm8, %v1609_v39  ;;  %v1604_v5 = vadd.f32 %v3169_v57, %v1603_v28  ;;  %v1104_v9 = vpop.xlane.xlu1 %1103  ;;  %v1171_v10 = vsel %vm485_vm1, %v3201_v24, 0.0 }
 0x1b6   : > { %2332 = vpow2.f32 %v1147_v25  ;;  %v1120_v17 = vsub.f32 %v3059_v11, %v1104_v9  ;;  %1169 = vadd.xlane.f32.xlu1 %v1168_v1  ;;  %1172 = vadd.xlane.f32.xlu0 %v1171_v10  ;;  %v2218_v23 = vpop.f32.mrf.mxu0 }
 0x1b7   : > { %v3211_v36 = vpop.eup %2320  ;;  %2334 = vpow2.f32 %v1149_v30  ;;  %1674 = vst.msk [vmem:[%s3178_s0 + $0x10] sm:$0xff] %vm3553_vm9, %v1604_v5  ;;  %v1619_v48 = vadd.f32 %v2218_v23, %v3169_v57 }
 0x1b8   : > { %v3216_v52 = vpop.eup %2322  ;;  %v1151_v0 = vmul.f32 1.442695, %v1120_v17  ;;  %v1613_v4 = vpop.f32.mrf.mxu0  ;;  %v1174_v15 = vsel %vm485_vm1, %v3211_v36, 0.0 }
 0x1b9   : > { %1677 = vst.msk [vmem:[%s3178_s0 + $0x28] sm:$0xff] %vm3554_vm10, %v1619_v48  ;;  %v1614_v11 = vadd.f32 %v3169_v57, %v1613_v4  ;;  %v1177_v22 = vsel %vm485_vm1, %v3216_v52, 0.0 }
 0x1ba   : > { %2336 = vpow2.f32 %v1151_v0  ;;  %1175 = vadd.xlane.f32.xlu1 %v1174_v15  ;;  %1178 = vadd.xlane.f32.xlu0 %v1177_v22 }
 0x1bb   : > { %v3225_v20 = vpop.eup %2324  ;;  %1676 = vst.msk [vmem:[%s3178_s0 + $0x20] sm:$0xff] %vm3555_vm11, %v1614_v11 }
 0x1bc   : > { %v3229_v47 = vpop.eup %2326  ;;  %v1180_v27 = vsel %vm485_vm1, %v3225_v20, 0.0 }
 0x1bd   : > { %v1183_v40 = vsel %vm485_vm1, %v3229_v47, 0.0 }
 0x1be   : > { %1181 = vadd.xlane.f32.xlu1 %v1180_v27  ;;  %1184 = vadd.xlane.f32.xlu0 %v1183_v40 }
 0x1bf   : > { %v3235_v29 = vpop.eup %2328 }
 0x1c0   : > { %v3237_v31 = vpop.eup %2330  ;;  %v1186_v32 = vsel %vm485_vm1, %v3235_v29, 0.0 }
 0x1c1   : > { %v1189_v55 = vsel %vm485_vm1, %v3237_v31, 0.0 }
 0x1c2   : > { %1187 = vadd.xlane.f32.xlu1 %v1186_v32  ;;  %1190 = vadd.xlane.f32.xlu0 %v1189_v55 }
 0x1c3   : > { %v3243_v33 = vpop.eup %2332 }
 0x1c4   : > { %v3245_v61 = vpop.eup %2334  ;;  %v1192_v41 = vsel %vm485_vm1, %v3243_v33, 0.0 }
 0x1c5   : > { %v1195_v42 = vsel %vm485_vm1, %v3245_v61, 0.0 }
 0x1c6   : > { %1193 = vadd.xlane.f32.xlu1 %v1192_v41  ;;  %1196 = vadd.xlane.f32.xlu0 %v1195_v42 }
 0x1c7   : > { %v3251_v44 = vpop.eup %2336 }
 0x1c8   : > { %v1198_v3 = vsel %vm485_vm1, %v3251_v44, 0.0 }
 0x1ca   : > { %1199 = vadd.xlane.f32.xlu1 %v1198_v3 }
 0x206   : > { %v894_v53 = vpop.f32.mrf.mxu1 }
 0x207   : > { %v2236_v37 = vtrunc.f32 %v894_v53 }
 0x208   : > { %v2175_v18 = vpop.f32.mrf.mxu1 }
 0x209   : > { %v2237_v51 = vcvt.f32.s32 %v2236_v37 }
 0x20a   : > { %v2221_v54 = vpop.f32.mrf.mxu1 }
 0x20b   : > { %899 = vst [vmem:[%s439_s27] sm:$0x1] %v2237_v51  ;;  %v1629_v58 = vadd.f32 %v2221_v54, %v3169_v57 }
 0x20c   : > { %v1623_v34 = vpop.f32.mrf.mxu1 }
 0x20d   : > { %1679 = vst.msk [vmem:[%s3178_s0 + $0x38] sm:$0xff] %vm3556_vm12, %v1629_v58  ;;  %v1624_v60 = vadd.f32 %v3169_v57, %v1623_v34 }
 0x20e   : > { %v2224_v45 = vpop.f32.mrf.mxu1 }
 0x20f   : > { %1678 = vst.msk [vmem:[%s3178_s0 + $0x30] sm:$0xff] %vm3557_vm13, %v1624_v60  ;;  %v1639_v43 = vadd.f32 %v2224_v45, %v3169_v57 }
 0x210   : > { %v1633_v62 = vpop.f32.mrf.mxu1 }
 0x211   : > { %1681 = vst.msk [vmem:[%s3178_s0 + $0x48] sm:$0xff] %vm3558_vm14, %v1639_v43  ;;  %v1634_v7 = vadd.f32 %v3169_v57, %v1633_v62 }
 0x212   : > { %v2227_v8 = vpop.f32.mrf.mxu1 }
 0x213   : > { %1680 = vst.msk [vmem:[%s3178_s0 + $0x40] sm:$0xff] %vm3559_vm15, %v1634_v7  ;;  %v1649_v12 = vadd.f32 %v2227_v8, %v3169_v57 }
 0x214   : > { %v1643_v14 = vpop.f32.mrf.mxu1 }
 0x215   : > { %1683 = vst.msk [vmem:[%s3178_s0 + $0x58] sm:$0xff] %vm3560_vm3, %v1649_v12  ;;  %v1644_v59 = vadd.f32 %v3169_v57, %v1643_v14 }
 0x216   : > { %v2230_v56 = vpop.f32.mrf.mxu1 }
 0x217   : > { %1682 = vst.msk [vmem:[%s3178_s0 + $0x50] sm:$0xff] %vm3561_vm0, %v1644_v59  ;;  %v1659_v16 = vadd.f32 %v2230_v56, %v3169_v57 }
 0x218   : > { %v1653_v26 = vpop.f32.mrf.mxu1 }
 0x219   : > { %1685 = vst.msk [vmem:[%s3178_s0 + $0x68] sm:$0xff] %vm3562_vm5, %v1659_v16  ;;  %v1654_v63 = vadd.f32 %v3169_v57, %v1653_v26 }
 0x21a   : > { %v2233_v6 = vpop.f32.mrf.mxu1 }
 0x21b   : > { %1684 = vst.msk [vmem:[%s3178_s0 + $0x60] sm:$0xff] %vm3563_vm6, %v1654_v63  ;;  %v1669_v19 = vadd.f32 %v2233_v6, %v3169_v57 }
 0x21c   : > { %v1663_v46 = vpop.f32.mrf.mxu1 }
 0x21d   : > { %1687 = vst.msk [vmem:[%s3178_s0 + $0x78] sm:$0xff] %vm3564_vm4, %v1669_v19  ;;  %v1664_v35 = vadd.f32 %v3169_v57, %v1663_v46 }
 0x21e   : > { %2415 = shalt.err (!%p2412_p6)
}
 0x21f   : > { %s2416_s28 = scalar_lea.hbm %s3285_s18, 16  ;;  %s2420_s2 = scalar_lea.hbm %s3522_s9, 32 }
 0x220   : > { %p2417_p7 = scmp.ne.s32.totalorder %s3285_s18, %s2416_s28  ;;  %p2421_p11 = scmp.lt.s32.totalorder %s3285_s18, %s3522_s9 }
 0x221   : > { %p2422_p12 = scmp.lt.s32.totalorder %s2420_s2, %s2416_s28 }
 0x222   : > { %p2418_p9 = pnand %p2417_p7, %p2649_p4 }
 0x223   : > { %p2423_p13 = por %p2422_p12, %p2421_p11 }
 0x224   : > { %p2419_p10 = pneg %p2418_p9 }
 0x226   : > { %p2424_p0 = pnand %p2423_p13, %p2419_p10 }
 0x228   : > { %2427 = shalt.err (!%p2424_p0)
}
 0x229   : > { %2238 = dma.vmem_to_hbm [thread:$0]  (%p2649_p4), %s1728_s20, 16, %s3285_s18, %s1695_s30   ;;  %vm3565_vm2 = vmmov %vm3561_vm0  ;;  %vm1352_vm7 = vcmask 122880  }
 0x22a   : > { %1686 = vst.msk [vmem:[%s3178_s0 + $0x70] sm:$0xff] %vm3565_vm2, %v1664_v35  ;;  %s3566_s0 = sadd.s32 4294967295, %s2534_s26   ;;  %s2031_s3 = sshll.u32 %s2526_s24, 7 }
 0x22b   : > { %s3422_s1 = sand.u32 1, %s3566_s0   ;;  %s1740_s4 = sshll.u32 %s3121_s29, 4  ;;  %s3433_s4 = int_to_ptr.vmem [resolvable:$true] %s1740_s4 }
 0x22c   : > { %s1756_s18 = sshll.u32 %s3126_s17, 4  ;;  %s3431_s28 = scalar_lea.hbm %s3523_s10, %s2031_s3  ;;  %s3440_s18 = int_to_ptr.vmem [resolvable:$true] %s1756_s18 }
 0x22d   : > { %s3438_s2 = scalar_lea.hbm %s3525_s12, %s2031_s3  ;;  %s1699_s24 = scalar_lea.sflag [#allocation5], %s3422_s1 }
 0x22e   : > { %s2540_s19 = smov [#allocation4]  }
 0x22f   : > { %s2432_s25 = sshll.u32 %s2540_s19, 4  ;;  %s2433_s25 = int_to_ptr.vmem [resolvable:$false] %s2432_s25 }
 0x230   : > { %s2434_s0 = scalar_lea.vmem %s2433_s25, 256  ;;  %p2435_p5 = scmp.lt.s32.totalorder %s3433_s4, %s2433_s25 }
 0x232   : > { %v1155_v57 = vpop.xlane.xlu0 %1154 }
 0x233   : > { %2338 = vrcp.f32 %v1155_v57 }
 0x236   : > { %v1161_v25 = vpop.xlane.xlu0 %1160 }
 0x237   : > { %v1158_v39 = vpop.xlane.xlu1 %1157 }
 0x238   : > { %2340 = vrcp.f32 %v1158_v39 }
 0x239   : > { %2342 = vrcp.f32 %v1161_v25 }
 0x23b   : > { %v1164_v28 = vpop.xlane.xlu1 %1163  ;;  %v1167_v1 = vpop.xlane.xlu0 %1166 }
 0x23c   : > { %2344 = vrcp.f32 %v1164_v28 }
 0x23d   : > { %2346 = vrcp.f32 %v1167_v1 }
 0x23f   : > { %v1170_v30 = vpop.xlane.xlu1 %1169  ;;  %v1173_v5 = vpop.xlane.xlu0 %1172 }
 0x240   : > { %2348 = vrcp.f32 %v1170_v30  ;;  %v2339_v9 = vpop.eup %2338 }
 0x241   : > { %2350 = vrcp.f32 %v1173_v5  ;;  %v3310_v10 = vmul.f32 %v2339_v9, %v3154_v38 }
 0x243   : > { %v1176_v17 = vpop.xlane.xlu1 %1175  ;;  %v1179_v23 = vpop.xlane.xlu0 %1178  ;;  %v1249_v48 = vmax.f32 %v3310_v10, 1e-20  ;;  %v1355_v38 = vsel %vm485_vm1, %v3310_v10, 0.0  ;;  %v1233_v57 = vsub.f32 0.0, %v3310_v10 }
 0x244   : > { %2352 = vrcp.f32 %v1176_v17 }
 0x245   : > { %v2341_v0 = vpop.eup %2340  ;;  %2354 = vrcp.f32 %v1179_v23 }
 0x246   : > { %v2343_v4 = vpop.eup %2342  ;;  %2356 = vlog2.f32 %v1249_v48  ;;  %v3314_v15 = vmul.f32 %v2341_v0, %v3162_v21 }
 0x247   : > { %v3317_v11 = vmul.f32 %v2343_v4, %v3159_v49  ;;  %v1182_v22 = vpop.xlane.xlu1 %1181  ;;  %v1185_v42 = vpop.xlane.xlu0 %1184 }
 0x248   : > { %v1250_v27 = vmax.f32 %v3314_v15, 1e-20  ;;  %v1356_v40 = vsel %vm485_vm1, %v3314_v15, 0.0  ;;  %2358 = vrcp.f32 %v1182_v22  ;;  %v1234_v5 = vsub.f32 0.0, %v3314_v15 }
 0x249   : > { %v2345_v32 = vpop.eup %2344  ;;  %v1357_v55 = vadd.f32 %v1356_v40, %v1355_v38  ;;  %v1251_v41 = vmax.f32 %v3317_v11, 1e-20  ;;  %v1358_v49 = vsel %vm485_vm1, %v3317_v11, 0.0  ;;  %v1235_v10 = vsub.f32 0.0, %v3317_v11 }
 0x24a   : > { %v2347_v21 = vpop.eup %2346  ;;  %2360 = vlog2.f32 %v1250_v27  ;;  %v3328_v3 = vmul.f32 %v2345_v32, %v3181_v2 }
 0x24b   : > { %2362 = vlog2.f32 %v1251_v41  ;;  %v1359_v53 = vadd.f32 %v1358_v49, %v1357_v55  ;;  %v3331_v37 = vmul.f32 %v2347_v21, %v3185_v13  ;;  %v1188_v60 = vpop.xlane.xlu1 %1187  ;;  %v1191_v25 = vpop.xlane.xlu0 %1190 }
 0x24c   : > { %v1252_v18 = vmax.f32 %v3328_v3, 1e-20  ;;  %v1360_v51 = vsel %vm485_vm1, %v3328_v3, 0.0  ;;  %2364 = vrcp.f32 %v1185_v42  ;;  %v1236_v4 = vsub.f32 0.0, %v3328_v3 }
 0x24d   : > { %v2349_v54 = vpop.eup %2348  ;;  %v1361_v58 = vadd.f32 %v1360_v51, %v1359_v53  ;;  %v1253_v34 = vmax.f32 %v3331_v37, 1e-20  ;;  %v1362_v2 = vsel %vm485_vm1, %v3331_v37, 0.0 }
 0x24e   : > { %v2351_v45 = vpop.eup %2350  ;;  %2366 = vlog2.f32 %v1252_v18  ;;  %v3340_v43 = vmul.f32 %v2349_v54, %v3195_v50 }
 0x24f   : > { %2368 = vlog2.f32 %v1253_v34  ;;  %v1363_v13 = vadd.f32 %v1362_v2, %v1361_v58  ;;  %v3343_v62 = vmul.f32 %v2351_v45, %v3201_v24  ;;  %v1194_v23 = vpop.xlane.xlu1 %1193  ;;  %v1197_v49 = vpop.xlane.xlu0 %1196 }
 0x250   : > { %v1254_v7 = vmax.f32 %v3340_v43, 1e-20  ;;  %v1364_v8 = vsel %vm485_vm1, %v3340_v43, 0.0  ;;  %2370 = vrcp.f32 %v1188_v60 }
 0x251   : > { %v2353_v12 = vpop.eup %2352  ;;  %v1365_v14 = vadd.f32 %v1364_v8, %v1363_v13  ;;  %v1255_v59 = vmax.f32 %v3343_v62, 1e-20  ;;  %v1366_v50 = vsel %vm485_vm1, %v3343_v62, 0.0  ;;  %v1238_v8 = vsub.f32 0.0, %v3340_v43 }
 0x252   : > { %v2355_v56 = vpop.eup %2354  ;;  %2372 = vlog2.f32 %v1254_v7  ;;  %v3352_v16 = vmul.f32 %v2353_v12, %v3211_v36 }
 0x253   : > { %v2357_v24 = vpop.eup %2356  ;;  %2374 = vlog2.f32 %v1255_v59  ;;  %v1367_v26 = vadd.f32 %v1366_v50, %v1365_v14  ;;  %v3355_v63 = vmul.f32 %v2355_v56, %v3216_v52  ;;  %v1200_v14 = vpop.xlane.xlu1 %1199  ;;  %v1239_v56 = vsub.f32 0.0, %v3343_v62 }
 0x254   : > { %v1266_v6 = vmul.f32 0.6931472, %v2357_v24  ;;  %v1256_v19 = vmax.f32 %v3352_v16, 1e-20  ;;  %v1368_v46 = vsel %vm485_vm1, %v3352_v16, 0.0 }
 0x255   : > { %v2359_v35 = vpop.eup %2358  ;;  %v1257_v39 = vmax.f32 %v3355_v63, 1e-20  ;;  %v1369_v52 = vadd.f32 %v1368_v46, %v1367_v26  ;;  %v1370_v22 = vsel %vm485_vm1, %v3355_v63, 0.0 }
 0x256   : > { %2376 = vlog2.f32 %v1256_v19  ;;  %v3363_v36 = vmul.f32 %v2359_v35, %v3225_v20  ;;  %v1297_v1 = vmul.f32 %v1266_v6, %v1233_v57 }
 0x257   : > { %v2361_v28 = vpop.eup %2360  ;;  %2378 = vlog2.f32 %v1257_v39  ;;  %v1371_v32 = vadd.f32 %v1370_v22, %v1369_v52  ;;  %v1240_v39 = vsub.f32 0.0, %v3352_v16 }
 0x258   : > { %v2363_v30 = vpop.eup %2362  ;;  %v1268_v9 = vmul.f32 0.6931472, %v2361_v28  ;;  %v1258_v17 = vmax.f32 %v3363_v36, 1e-20  ;;  %2380 = vrcp.f32 %v1191_v25  ;;  %v1314_v27 = vsel %vm485_vm1, %v1297_v1, 0.0 }
 0x259   : > { %v2365_v48 = vpop.eup %2364  ;;  %v1270_v0 = vmul.f32 0.6931472, %v2363_v30  ;;  %v1372_v42 = vsel %vm485_vm1, %v3363_v36, 0.0  ;;  %v1242_v22 = vsub.f32 0.0, %v3363_v36 }
 0x25a   : > { %v1298_v20 = vmul.f32 %v1268_v9, %v1234_v5  ;;  %2382 = vlog2.f32 %v1258_v17  ;;  %v3372_v38 = vmul.f32 %v2365_v48, %v3229_v47  ;;  %v1237_v47 = vsub.f32 0.0, %v3331_v37 }
 0x25b   : > { %v2367_v15 = vpop.eup %2366  ;;  %v1299_v40 = vmul.f32 %v1270_v0, %v1235_v10  ;;  %2384 = vrcp.f32 %v1194_v23  ;;  %v1373_v2 = vadd.f32 %v1372_v42, %v1371_v32  ;;  %v1241_v23 = vsub.f32 0.0, %v3355_v63 }
 0x25c   : > { %v2369_v55 = vpop.eup %2368  ;;  %v1315_v11 = vsel %vm485_vm1, %v1298_v20, 0.0  ;;  %v1272_v41 = vmul.f32 0.6931472, %v2367_v15  ;;  %v1259_v21 = vmax.f32 %v3372_v38, 1e-20  ;;  %v1374_v26 = vsel %vm485_vm1, %v3372_v38, 0.0 }
 0x25d   : > { %v2371_v3 = vpop.eup %2370  ;;  %v1316_v53 = vadd.f32 %v1315_v11, %v1314_v27  ;;  %v1274_v18 = vmul.f32 0.6931472, %v2369_v55  ;;  %v1317_v51 = vsel %vm485_vm1, %v1299_v40, 0.0  ;;  %v1375_v35 = vadd.f32 %v1374_v26, %v1373_v2 }
 0x25e   : > { %v1300_v54 = vmul.f32 %v1272_v41, %v1236_v4  ;;  %2386 = vlog2.f32 %v1259_v21  ;;  %v3382_v58 = vmul.f32 %v2371_v3, %v3235_v29 }
 0x25f   : > { %v2373_v34 = vpop.eup %2372  ;;  %v1318_v60 = vadd.f32 %v1317_v51, %v1316_v53  ;;  %v1301_v45 = vmul.f32 %v1274_v18, %v1237_v47  ;;  %2388 = vrcp.f32 %v1197_v49 }
 0x260   : > { %v2375_v13 = vpop.eup %2374  ;;  %v1319_v7 = vsel %vm485_vm1, %v1300_v54, 0.0  ;;  %v1276_v12 = vmul.f32 0.6931472, %v2373_v34  ;;  %v1260_v37 = vmax.f32 %v3382_v58, 1e-20  ;;  %v1376_v62 = vsel %vm485_vm1, %v3382_v58, 0.0 }
 0x261   : > { %v1320_v59 = vadd.f32 %v1319_v7, %v1318_v60  ;;  %v1278_v50 = vmul.f32 0.6931472, %v2375_v13  ;;  %v1321_v29 = vsel %vm485_vm1, %v1301_v45, 0.0  ;;  %v1377_v48 = vadd.f32 %v1376_v62, %v1375_v35 }
 0x262   : > { %v1302_v24 = vmul.f32 %v1276_v12, %v1238_v8  ;;  %2390 = vlog2.f32 %v1260_v37  ;;  %v1244_v13 = vsub.f32 0.0, %v3382_v58 }
 0x263   : > { %v2377_v6 = vpop.eup %2376  ;;  %v1322_v19 = vadd.f32 %v1321_v29, %v1320_v59  ;;  %v1303_v46 = vmul.f32 %v1278_v50, %v1239_v56  ;;  %2392 = vrcp.f32 %v1200_v14 }
 0x264   : > { %v2379_v43 = vpop.eup %2378  ;;  %v1323_v57 = vsel %vm485_vm1, %v1302_v24, 0.0  ;;  %v1280_v25 = vmul.f32 0.6931472, %v2377_v6 }
 0x265   : > { %v1324_v28 = vadd.f32 %v1323_v57, %v1322_v19  ;;  %v1282_v1 = vmul.f32 0.6931472, %v2379_v43  ;;  %v2381_v52 = vpop.eup %2380  ;;  %v1325_v30 = vsel %vm485_vm1, %v1303_v46, 0.0 }
 0x266   : > { %v1304_v5 = vmul.f32 %v1280_v25, %v1240_v39  ;;  %v1226_v10 = vmul.f32 %v2381_v52, %v3237_v31 }
 0x267   : > { %v2383_v9 = vpop.eup %2382  ;;  %v1326_v17 = vadd.f32 %v1325_v30, %v1324_v28  ;;  %v1305_v20 = vmul.f32 %v1282_v1, %v1241_v23 }
 0x268   : > { %v2385_v0 = vpop.eup %2384  ;;  %v1327_v16 = vsel %vm485_vm1, %v1304_v5, 0.0  ;;  %v1284_v4 = vmul.f32 0.6931472, %v2383_v9  ;;  %v1261_v15 = vmax.f32 %v1226_v10, 1e-20  ;;  %v1378_v40 = vsel %vm485_vm1, %v1226_v10, 0.0 }
 0x269   : > { %v1328_v27 = vadd.f32 %v1327_v16, %v1326_v17  ;;  %v1228_v32 = vmul.f32 %v2385_v0, %v3243_v33  ;;  %v1379_v63 = vadd.f32 %v1378_v40, %v1377_v48  ;;  %v1329_v31 = vsel %vm485_vm1, %v1305_v20, 0.0  ;;  %v1354_v5 = vld [vmem:[%s3126_s17] sm:$0x1] }
 0x26a   : > { %v1306_v11 = vmul.f32 %v1284_v4, %v1242_v22  ;;  %2394 = vlog2.f32 %v1261_v15  ;;  %v1243_v33 = vsub.f32 0.0, %v3372_v38  ;;  %v1245_v26 = vsub.f32 0.0, %v1226_v10 }
 0x26b   : > { %v2387_v55 = vpop.eup %2386  ;;  %v1262_v42 = vmax.f32 %v1228_v32, 1e-20  ;;  %v1380_v49 = vsel %vm485_vm1, %v1228_v32, 0.0  ;;  %v1330_v36 = vadd.f32 %v1329_v31, %v1328_v27  ;;  %v1246_v35 = vsub.f32 0.0, %v1228_v32 }
 0x26c   : > { %v2389_v41 = vpop.eup %2388  ;;  %v1286_v21 = vmul.f32 0.6931472, %v2387_v55  ;;  %v1381_v53 = vadd.f32 %v1380_v49, %v1379_v63  ;;  %v1331_v18 = vsel %vm485_vm1, %v1306_v11, 0.0 }
 0x26d   : > { %v1230_v3 = vmul.f32 %v2389_v41, %v3245_v61  ;;  %2396 = vlog2.f32 %v1262_v42  ;;  %v1332_v7 = vadd.f32 %v1331_v18, %v1330_v36  ;;  %v1313_v42 = vld [vmem:[%s3121_s29] sm:$0x1] }
 0x26e   : > { %v1307_v2 = vmul.f32 %v1286_v21, %v1243_v33 }
 0x26f   : > { %v2391_v47 = vpop.eup %2390  ;;  %v1263_v51 = vmax.f32 %v1230_v3, 1e-20  ;;  %v1382_v54 = vsel %vm485_vm1, %v1230_v3, 0.0  ;;  %v1247_v52 = vsub.f32 0.0, %v1230_v3 }
 0x270   : > { %v2393_v34 = vpop.eup %2392  ;;  %v1288_v60 = vmul.f32 0.6931472, %v2391_v47  ;;  %v1383_v45 = vadd.f32 %v1382_v54, %v1381_v53  ;;  %v1333_v38 = vsel %vm485_vm1, %v1307_v2, 0.0 }
 0x271   : > { %2398 = vlog2.f32 %v1263_v51  ;;  %v1232_v61 = vmul.f32 %v2393_v34, %v3251_v44  ;;  %v1334_v59 = vadd.f32 %v1333_v38, %v1332_v7 }
 0x272   : > { %v1308_v8 = vmul.f32 %v1288_v60, %v1244_v13 }
 0x273   : > { %v1264_v12 = vmax.f32 %v1232_v61, 1e-20  ;;  %v1384_v37 = vsel %vm485_vm1, %v1232_v61, 0.0  ;;  %v1248_v4 = vsub.f32 0.0, %v1232_v61 }
 0x274   : > { %v1385_v14 = vadd.f32 %v1384_v37, %v1383_v45  ;;  %v1335_v50 = vsel %vm485_vm1, %v1308_v8, 0.0 }
 0x275   : > { %2400 = vlog2.f32 %v1264_v12  ;;  %v1336_v6 = vadd.f32 %v1335_v50, %v1334_v59 }
 0x276   : > { %v1386_v56 = vrot.slane %v1385_v14, 4 }
 0x277   : > { %v2395_v29 = vpop.eup %2394 }
 0x278   : > { %v1387_v24 = vadd.f32 %v1386_v56, %v1385_v14  ;;  %v1290_v58 = vmul.f32 0.6931472, %v2395_v29 }
 0x27a   : > { %v1388_v44 = vrot.slane %v1387_v24, 2  ;;  %v2397_v19 = vpop.eup %2396  ;;  %v1309_v46 = vmul.f32 %v1290_v58, %v1245_v26 }
 0x27b   : > { %v1292_v43 = vmul.f32 0.6931472, %v2397_v19 }
 0x27c   : > { %v1389_v57 = vadd.f32 %v1388_v44, %v1387_v24  ;;  %v1337_v39 = vsel %vm485_vm1, %v1309_v46, 0.0 }
 0x27d   : > { %v1338_v62 = vadd.f32 %v1337_v39, %v1336_v6  ;;  %v1310_v28 = vmul.f32 %v1292_v43, %v1246_v35 }
 0x27e   : > { %v2399_v25 = vpop.eup %2398  ;;  %v1390_v1 = vrot.slane %v1389_v57, 1 }
 0x27f   : > { %v1294_v30 = vmul.f32 0.6931472, %v2399_v25  ;;  %v1339_v9 = vsel %vm485_vm1, %v1310_v28, 0.0 }
 0x280   : > { %v1391_v17 = vadd.f32 %v1390_v1, %v1389_v57  ;;  %v1340_v23 = vadd.f32 %v1339_v9, %v1338_v62 }
 0x281   : > { %v1311_v48 = vmul.f32 %v1294_v30, %v1247_v52 }
 0x282   : > { %v2401_v10 = vpop.eup %2400  ;;  %v1392_v0 = vadd.f32 %v1391_v17, %v1354_v5 }
 0x283   : > { %v1341_v16 = vsel %vm485_vm1, %v1311_v48, 0.0  ;;  %v1296_v20 = vmul.f32 0.6931472, %v2401_v10 }
 0x284   : > { %v1342_v22 = vadd.f32 %v1341_v16, %v1340_v23  ;;  %1393 = vst.msk [vmem:[%s3126_s17] sm:$0x1] %vm1352_vm7, %v1392_v0  ;;  %s2428_s17 = scalar_lea.vmem %s3433_s4, 128 }
 0x285   : > { %v1312_v15 = vmul.f32 %v1296_v20, %v1248_v4  ;;  %p2429_p1 = scmp.ne.s32.totalorder %s3433_s4, %s2428_s17  ;;  %p2436_p6 = scmp.lt.s32.totalorder %s2434_s0, %s2428_s17 }
 0x287   : > { %v1343_v27 = vsel %vm485_vm1, %v1312_v15, 0.0  ;;  %p2430_p2 = pnand %p2429_p1, %p2649_p4  ;;  %p2437_p7 = por %p2436_p6, %p2435_p5 }
 0x288   : > { %v1344_v40 = vadd.f32 %v1343_v27, %v1342_v22 }
 0x289   : > { %p2431_p3 = pneg %p2430_p2 }
 0x28a   : > { %v1345_v32 = vrot.slane %v1344_v40, 4 }
 0x28b   : > { %p2438_p9 = pnand %p2437_p7, %p2431_p3 }
 0x28c   : > { %v1346_v55 = vadd.f32 %v1345_v32, %v1344_v40 }
 0x28e   : > { %v1347_v11 = vrot.slane %v1346_v55, 2 }
 0x290   : > { %v1348_v63 = vadd.f32 %v1347_v11, %v1346_v55 }
 0x292   : > { %v1349_v41 = vrot.slane %v1348_v63, 1 }
 0x294   : > { %v1350_v31 = vadd.f32 %v1349_v41, %v1348_v63 }
 0x296   : > { %v1351_v21 = vadd.f32 %v1350_v31, %v1313_v42 }
 0x298   : > { %1353 = vst.msk [vmem:[%s3121_s29] sm:$0x1] %vm1352_vm7, %v1351_v21 }
 0x299   : > { %2441 = shalt.err (!%p2438_p9)
}
 0x29a   : > { %s2442_s29 = scalar_lea.hbm %s3431_s28, 128  ;;  %s2446_s30 = scalar_lea.hbm %s3523_s10, 256 }
 0x29b   : > { %p2443_p10 = scmp.ne.s32.totalorder %s3431_s28, %s2442_s29  ;;  %p2447_p13 = scmp.lt.s32.totalorder %s3431_s28, %s3523_s10 }
 0x29c   : > { %p2448_p0 = scmp.lt.s32.totalorder %s2446_s30, %s2442_s29 }
 0x29d   : > { %p2444_p11 = pnand %p2443_p10, %p2649_p4 }
 0x29e   : > { %p2449_p1 = por %p2448_p0, %p2447_p13 }
 0x29f   : > { %p2445_p12 = pneg %p2444_p11 }
 0x2a1   : > { %p2450_p2 = pnand %p2449_p1, %p2445_p12 }
 0x2a3   : > { %2453 = shalt.err (!%p2450_p2)
}
 0x2a4   : > { %2239 = dma.vmem_to_hbm [thread:$0]  (%p2649_p4), %s3433_s4, 128, %s3431_s28, %s1699_s24  }
 0x2a5   : > { %s2454_s17 = scalar_lea.vmem %s3440_s18, 128  ;;  %s2541_s19 = smov [#allocation6]  }
 0x2a6   : > { %p2455_p3 = scmp.ne.s32.totalorder %s3440_s18, %s2454_s17  ;;  %s2458_s25 = sshll.u32 %s2541_s19, 4  ;;  %s2459_s25 = int_to_ptr.vmem [resolvable:$false] %s2458_s25 }
 0x2a7   : > { %s2460_s0 = scalar_lea.vmem %s2459_s25, 256  ;;  %p2461_p7 = scmp.lt.s32.totalorder %s3440_s18, %s2459_s25 }
 0x2a8   : > { %p2456_p5 = pnand %p2455_p3, %p2649_p4  ;;  %p2462_p9 = scmp.lt.s32.totalorder %s2460_s0, %s2454_s17 }
 0x2aa   : > { %p2457_p6 = pneg %p2456_p5  ;;  %p2463_p10 = por %p2462_p9, %p2461_p7 }
 0x2ac   : > { %p2464_p11 = pnand %p2463_p10, %p2457_p6 }
 0x2ae   : > { %2467 = shalt.err (!%p2464_p11)
}
 0x2af   : > { %s2468_s29 = scalar_lea.hbm %s3438_s2, 128  ;;  %s2472_s3 = scalar_lea.hbm %s3525_s12, 256 }
 0x2b0   : > { %p2469_p12 = scmp.ne.s32.totalorder %s3438_s2, %s2468_s29  ;;  %p2473_p1 = scmp.lt.s32.totalorder %s3438_s2, %s3525_s12 }
 0x2b1   : > { %p2474_p2 = scmp.lt.s32.totalorder %s2472_s3, %s2468_s29 }
 0x2b2   : > { %p2470_p13 = pnand %p2469_p12, %p2649_p4 }
 0x2b3   : > { %p2475_p3 = por %p2474_p2, %p2473_p1 }
 0x2b4   : > { %p2471_p0 = pneg %p2470_p13 }
 0x2b6   : > { %p2476_p5 = pnand %p2475_p3, %p2471_p0 }
 0x2b8   : > { %2479 = shalt.err (!%p2476_p5)
}
 0x2b9   : > { %2240 = dma.vmem_to_hbm [thread:$0]  (%p2649_p4), %s3440_s18, 128, %s3438_s2, %s1699_s24  }
 0x2ba PF: > { %p2254_p6 = scmp.ge.s32.totalorder %s2534_s26, 2  ;;  %s1777_s14 = sand.u32 1, %s2514_s21  }
 0x2bb   : > { %s1778_s27 = scalar_lea.sflag [#allocation3], %s1777_s14 }
 0x2bc   : > { %p2245_p7 = pnand %p2254_p6, %p2658_p8 }
 0x2be   : > { %p2246_p9 = pneg %p2245_p7 }
 0x2c0   : > { %2505 = dma.done.wait (%p2246_p9), %s1778_s27, 16  }
 0x2c1   : > { %2507 = vsyncadd (%p2246_p9), %s1778_s27, 4294967280  ;;  %s3567_s17 = sadd.s32 4294967294, %s2534_s26  }
 0x2c2   : > { %s1785_s13 = sand.u32 1, %s3567_s17  }
 0x2c3   : > { %s1786_s19 = scalar_lea.sflag [#allocation5], %s1785_s13 }
 0x2c4   : > { %2509 = dma.done.wait (%p2246_p9), %s1786_s19, 256  }
 0x2c5   : > { %2511 = vsyncadd (%p2246_p9), %s1786_s19, 4294967040  ;;  %s29_s26 = sadd.s32 1, %s2534_s26   ;;  %s3568_s24 = sld [smem:[#allocation9_spill]] }
 0x2c6   : > { %p26_p4 = scmp.ge.s32.totalorder %s29_s26, 4   ;;  %s3569_s25 = sld [smem:[#allocation10_spill]] }
 0x2c7   : > { %s3570_s21 = smov %s2518_s22  ;;  %s3571_s22 = smov %s2522_s23 }
 0x2c8   : > { %s3572_s23 = smov %s2664_s16  ;;  %28 = sbr.rel (!%p26_p4) target bundleno = 12 (0xc), region = 147 }
 0x2cd   :  { %1807 = vsyncpa [#allocation3], 1 }
 0x2ce   :  { %1809 = vsyncpa [#allocation3 + $0x1], 1 }
 0x2cf   :  { %1810 = vsyncpa [#allocation5], 1 }
 0x2d0   :  { %1812 = vsyncpa [#allocation5 + $0x1], 1 }

</bundles_post_ra>
